<compile_context>
chip_gen: v5e
topology: v5e:2x2
jax: 0.10.0
libtpu: 0.0.40
codegen_flags: <defaults>
</compile_context>

<pallas_src>
import functools

import jax
import jax.numpy as jnp
from jax.experimental import pallas as pl
from jax.experimental.pallas import tpu as pltpu


def _pick_tile(n, cap, candidates=(512, 256, 128, 64, 32, 16, 8)):
    """Largest candidate tile <= cap that divides n, else the full extent."""
    for c in candidates:
        if c <= cap and n % c == 0:
            return c
    # TODO(synk): pad N up to a multiple of 128/256 and mask the tail instead
    # of falling back to the full extent (can blow VMEM for large awkward N).
    return n


def _default_bf16_exp():
    """Use bf16 exp only where the EUP has a bf16 path (v6e/v7x)."""
    try:
        kind = jax.devices()[0].device_kind.lower()
    except Exception:
        return False
    return ("v6" in kind) or ("v7" in kind)


def _vmem_capacity_bytes():
    try:
        return int(pltpu.get_tpu_info().vmem_capacity_bytes)
    except Exception:
        return 64 * 1024 * 1024   # conservative default (v7x per-TC VMEM)


# --------------------------------------------------------------------------
# Kernel 1: fused q/k/v projection, head-major (H, TM, D) bf16 outputs.
# Softmax scale is folded into the q columns of w/b host-side.
# --------------------------------------------------------------------------
def _qkv_proj_kernel(x_ref, w_ref, b_ref, q_ref, k_ref, v_ref, *, num_heads):
    x = x_ref[0]                                                   # (TM, C) bf16
    y = jnp.dot(x, w_ref[...], preferred_element_type=jnp.float32) + b_ref[...]
    y = y.astype(q_ref.dtype)                                      # (TM, 3C) bf16
    TM, C3 = y.shape
    C = C3 // 3
    H = num_heads
    D = C // H
    # One-time O(N*C) head split keeps kernel 2's O(N^2) loop transpose-free.
    # TODO(synk): for D < 128, pack two heads per 128-lane "super-head" to keep
    # the head-major HBM layout fully lane-dense.
    q_ref[0] = jnp.transpose(y[:, 0 * C:1 * C].reshape(TM, H, D), (1, 0, 2))
    k_ref[0] = jnp.transpose(y[:, 1 * C:2 * C].reshape(TM, H, D), (1, 0, 2))
    v_ref[0] = jnp.transpose(y[:, 2 * C:3 * C].reshape(TM, H, D), (1, 0, 2))


# --------------------------------------------------------------------------
# Kernel 2: flash attention (online softmax over KV tiles) + output proj.
# --------------------------------------------------------------------------
def _flash_attn_proj_kernel(q_ref, k_ref, v_ref, wo_ref, bo_ref, o_ref,
                            m_sc, l_sc, acc_sc, *, bf16_exp):
    ki = pl.program_id(2)

    @pl.when(ki == 0)
    def _():
        m_sc[...] = jnp.full(m_sc.shape, -jnp.inf, dtype=m_sc.dtype)
        l_sc[...] = jnp.zeros(l_sc.shape, dtype=l_sc.dtype)
        acc_sc[...] = jnp.zeros(acc_sc.shape, dtype=acc_sc.dtype)

    qh = q_ref[0]                        # (H, TQ, D) bf16, pre-scaled
    kh = k_ref[0]                        # (H, TK, D) bf16
    vh = v_ref[0]                        # (H, TK, D) bf16

    # Batched per-head QK^T (contraction over D); no in-loop transposes.
    s = jnp.einsum('hqd,hkd->hqk', qh, kh,
                   preferred_element_type=jnp.float32)             # (H,TQ,TK) f32

    m_prev = m_sc[...]                                             # (H, TQ) f32
    m_new = jnp.maximum(m_prev, s.max(axis=-1))                    # (H, TQ)
    alpha = jnp.exp(m_prev - m_new)                                # (H, TQ)
    shifted = s - m_new[:, :, None]
    if bf16_exp:
        # v6e/v7x: EUP runs bf16 at double rate; p is consumed in bf16 anyway.
        p = jnp.exp(shifted.astype(jnp.bfloat16))
    else:
        p = jnp.exp(shifted)
    # TODO(synk): if a bundle dump shows XLU saturated, produce the row-sum via
    # the MXU (p @ ones) instead of jnp.sum.
    l_sc[...] = alpha * l_sc[...] + jnp.sum(p, axis=-1, dtype=jnp.float32)
    acc_sc[...] = alpha[:, :, None] * acc_sc[...] + jnp.einsum(
        'hqk,hkd->hqd', p.astype(jnp.bfloat16), vh,
        preferred_element_type=jnp.float32)
    m_sc[...] = m_new

    @pl.when(ki == pl.num_programs(2) - 1)
    def _():
        H, TQ, D = acc_sc.shape
        inv_l = pl.reciprocal(l_sc[...], approx=True)              # EUP slot
        out_h = acc_sc[...] * inv_l[:, :, None]                    # (H, TQ, D)
        out = jnp.transpose(out_h, (1, 0, 2)).reshape(TQ, H * D)   # 'h n d->n (h d)'
        y = jnp.dot(out.astype(jnp.bfloat16), wo_ref[...],
                    preferred_element_type=jnp.float32) + bo_ref[...]
        o_ref[0] = y.astype(o_ref.dtype)


# --------------------------------------------------------------------------
# Wrapper
# --------------------------------------------------------------------------
def attention_forward(x, params, *, num_heads, bf16_exp=None):
    """x: (B, N, C) f32.  params: weights (C_in, C_out), biases (1, C)."""
    # TODO(synk): mask, attn_drop/proj_drop > 0, cross-attention (key/value !=
    # query) and the qkv_fuse=True parameterization are not implemented.
    B, N, C = x.shape
    H = num_heads
    assert C % H == 0, "C must be divisible by num_heads"
    D = C // H
    scale = D ** (-0.5)
    if bf16_exp is None:
        bf16_exp = _default_bf16_exp()

    f32, bf16 = jnp.float32, jnp.bfloat16
    vmem_cap = _vmem_capacity_bytes()
    vmem_limit = min(int(vmem_cap * 0.75), 100 * 1024 * 1024)

    # Fold softmax scale into the q projection (host-side, free), fuse the
    # three projections into one (C, 3C) GEMM, and cast MXU operands to bf16
    # (accumulation stays f32 via preferred_element_type).
    wqkv = jnp.concatenate(
        [params["wq"] * scale, params["wk"], params["wv"]], axis=1).astype(bf16)
    bqkv = jnp.concatenate(
        [params["bq"] * scale, params["bk"], params["bv"]], axis=1).astype(f32)
    wo = params["wo"].astype(bf16)
    bo = params["bo"].astype(f32)
    xb = x.astype(bf16)

    # Tile caps: TQ/TK bounded so the (H, TQ, TK) temporaries fit VMEM; TK is
    # tightened further on 64-MiB-VMEM chips (v7x).
    TM = _pick_tile(N, cap=512)
    TQ = _pick_tile(N, cap=256)
    TK = _pick_tile(N, cap=256 if vmem_cap > 96 * 1024 * 1024 else 128)

    def run(single_buffer_consts):
        def const_spec(shape):
            kwargs = {}
            if single_buffer_consts:
                # Constant index_map -> no point double-buffering the weights.
                kwargs["pipeline_mode"] = pl.Buffered(1)
            return pl.BlockSpec(shape, lambda *_: (0,) * len(shape), **kwargs)

        # ---- Kernel 1: fused qkv projection, head-major outputs ------------
        head_out_spec = pl.BlockSpec((1, H, TM, D), lambda b, i: (b, 0, i, 0))
        q3, k3, v3 = pl.pallas_call(
            functools.partial(_qkv_proj_kernel, num_heads=H),
            out_shape=tuple(jax.ShapeDtypeStruct((B, H, N, D), bf16)
                            for _ in range(3)),
            grid_spec=pltpu.PrefetchScalarGridSpec(
                num_scalar_prefetch=0,
                grid=(B, N // TM),
                in_specs=[pl.BlockSpec((1, TM, C), lambda b, i: (b, i, 0)),
                          const_spec((C, 3 * C)),
                          const_spec((1, 3 * C))],
                out_specs=[head_out_spec, head_out_spec, head_out_spec],
            ),
            compiler_params=pltpu.CompilerParams(
                dimension_semantics=("parallel", "parallel"),
                vmem_limit_bytes=vmem_limit),
        )(xb, wqkv, bqkv)

        # ---- Kernel 2: flash attention + output projection -----------------
        q_spec = pl.BlockSpec((1, H, TQ, D), lambda b, qi, ki: (b, 0, qi, 0))
        kv_spec = pl.BlockSpec((1, H, TK, D), lambda b, qi, ki: (b, 0, ki, 0))
        # TODO(synk): sweep pipeline_mode=pl.Buffered(3) on k/v once VMEM
        # headroom is confirmed (KV DMA latency can be exposed for small D).
        return pl.pallas_call(
            functools.partial(_flash_attn_proj_kernel, bf16_exp=bf16_exp),
            out_shape=jax.ShapeDtypeStruct((B, N, C), x.dtype),
            grid_spec=pltpu.PrefetchScalarGridSpec(
                num_scalar_prefetch=0,
                grid=(B, N // TQ, N // TK),
                in_specs=[q_spec, kv_spec, kv_spec,
                          const_spec((C, C)), const_spec((1, C))],
                out_specs=pl.BlockSpec((1, TQ, C), lambda b, qi, ki: (b, qi, 0)),
                scratch_shapes=[
                    pltpu.VMEM((H, TQ), f32),      # m (running max, lane-dense)
                    pltpu.VMEM((H, TQ), f32),      # l (running denom)
                    pltpu.VMEM((H, TQ, D), f32),   # acc
                ]),
            compiler_params=pltpu.CompilerParams(
                dimension_semantics=("parallel", "parallel", "arbitrary"),
                vmem_limit_bytes=vmem_limit),
        )(q3, k3, v3, wo, bo)

    try:
        return run(single_buffer_consts=True)
    except Exception:
        # Fallback if pl.Buffered(1) is rejected by this jax/libtpu build.
        return run(single_buffer_consts=False)


# --------------------------------------------------------------------------
# Plain-JAX reference (mirrors the PyTorch forward; mask=None, no dropout).
# emulate_bf16 / emulate_bf16_exp reproduce the kernel's reduced precision.
# --------------------------------------------------------------------------
def _reference_forward(x, params, *, num_heads, emulate_bf16=False,
                       emulate_bf16_exp=False):
    B, N, C = x.shape
    D = C // num_heads
    scale = D ** (-0.5)
    r = ((lambda a: a.astype(jnp.bfloat16).astype(jnp.float32))
         if emulate_bf16 else (lambda a: a))
    q = r(x) @ r(params["wq"] * scale) + params["bq"] * scale
    k = r(x) @ r(params["wk"]) + params["bk"]
    v = r(x) @ r(params["wv"]) + params["bv"]
    q, k, v = r(q), r(k), r(v)                     # kernel stores q/k/v as bf16
    q = q.reshape(B, N, num_heads, D).transpose(0, 2, 1, 3)
    k = k.reshape(B, N, num_heads, D).transpose(0, 2, 1, 3)
    v = v.reshape(B, N, num_heads, D).transpose(0, 2, 1, 3)
    logits = jnp.einsum("bhnd,bhsd->bhns", q, k)   # scale already folded into q
    shifted = logits - logits.max(axis=-1, keepdims=True)
    if emulate_bf16_exp:
        shifted = shifted.astype(jnp.bfloat16).astype(jnp.float32)
    p = jnp.exp(shifted)
    attn = p / p.sum(axis=-1, keepdims=True)
    out = jnp.einsum("bhns,bhsd->bhnd", r(attn), v)
    out = out.transpose(0, 2, 1, 3).reshape(B, N, C)
    return r(out) @ r(params["wo"]) + params["bo"]


if __name__ == "__main__":
    B, N, C = 2, 8, 32
    num_heads = 4

    key = jax.random.PRNGKey(0)
    keys = jax.random.split(key, 9)
    init = lambda k, shape: (jax.random.normal(k, shape, dtype=jnp.float32)
                             * (1.0 / jnp.sqrt(jnp.float32(shape[0]))))

    # Weights stored as (C_in, C_out); biases as (1, C).
    params = {
        "wq": init(keys[0], (C, C)), "bq": init(keys[1], (1, C)),
        "wk": init(keys[2], (C, C)), "bk": init(keys[3], (1, C)),
        "wv": init(keys[4], (C, C)), "bv": init(keys[5], (1, C)),
        "wo": init(keys[6], (C, C)), "bo": init(keys[7], (1, C)),
    }
    x = jax.random.normal(keys[8], (B, N, C), dtype=jnp.float32)

    bf16_exp = _default_bf16_exp()
    out = attention_forward(x, params, num_heads=num_heads, bf16_exp=bf16_exp)
    out = jax.block_until_ready(out)
    assert out.shape == (B, N, C)

    # Tight check against a reference emulating the kernel's reduced precision;
    # loose sanity check against the pure-f32 reference.
    ref_bf16 = _reference_forward(x, params, num_heads=num_heads,
                                  emulate_bf16=True, emulate_bf16_exp=bf16_exp)
    ref_f32 = _reference_forward(x, params, num_heads=num_heads)
    assert jnp.allclose(out, ref_bf16, atol=2e-2, rtol=2e-2), (
        "mismatch vs bf16-emulated reference: "
        f"{float(jnp.max(jnp.abs(out - ref_bf16)))}")
    assert jnp.allclose(out, ref_f32, atol=2.5e-1, rtol=2.5e-1), (
        "mismatch vs f32 reference: "
        f"{float(jnp.max(jnp.abs(out - ref_f32)))}")

    print("KERNEL_OK")
</pallas_src>

<mosaic_0001>
module attributes {stable_mosaic.version = 11 : i64} {
  func.func @_qkv_proj_kernel(%arg0: i32, %arg1: i32, %arg2: memref<1x8x32xbf16, #tpu.memory_space<vmem>>, %arg3: memref<32x96xbf16, #tpu.memory_space<vmem>>, %arg4: memref<1x96xf32, #tpu.memory_space<vmem>>, %arg5: memref<1x4x8x8xbf16, #tpu.memory_space<vmem>>, %arg6: memref<1x4x8x8xbf16, #tpu.memory_space<vmem>>, %arg7: memref<1x4x8x8xbf16, #tpu.memory_space<vmem>>) attributes {dimension_semantics = [#tpu.dimension_semantics<parallel>, #tpu.dimension_semantics<parallel>], iteration_bounds = array<i64: 2, 1>, scalar_prefetch = 0 : i64, scratch_operands = 0 : i64, tpu.core_type = #tpu.core_type<tc>, window_params = [{transform_indices = @transform_0, window_bounds = array<i64: 1, 8, 32>}, {pipeline_mode = #tpu.pipeline_mode<synchronous>, transform_indices = @transform_1, window_bounds = array<i64: 32, 96>}, {pipeline_mode = #tpu.pipeline_mode<synchronous>, transform_indices = @transform_2, window_bounds = array<i64: 1, 96>}, {transform_indices = @transform_3, window_bounds = array<i64: 1, 4, 8, 8>}, {transform_indices = @transform_4, window_bounds = array<i64: 1, 4, 8, 8>}, {transform_indices = @transform_5, window_bounds = array<i64: 1, 4, 8, 8>}]} {
    %c0 = arith.constant 0 : index
    %c0_0 = arith.constant 0 : index
    %c0_1 = arith.constant 0 : index
    %0 = vector.load %arg2[%c0, %c0_0, %c0_1] : memref<1x8x32xbf16, #tpu.memory_space<vmem>>, vector<1x8x32xbf16>
    %1 = vector.shape_cast %0 : vector<1x8x32xbf16> to vector<8x32xbf16>
    %c0_2 = arith.constant 0 : index
    %c0_3 = arith.constant 0 : index
    %2 = vector.load %arg3[%c0_2, %c0_3] : memref<32x96xbf16, #tpu.memory_space<vmem>>, vector<32x96xbf16>
    %cst = arith.constant dense<0.000000e+00> : vector<8x96xf32>
    %3 = tpu.matmul %1, %2, %cst {dimension_numbers = #tpu.dot_dimension_numbers<[1], [0], [0], [1], [0, 0, 1, 1], [], []>} : vector<8x32xbf16>, vector<32x96xbf16>, vector<8x96xf32> -> vector<8x96xf32>
    %c0_4 = arith.constant 0 : index
    %c0_5 = arith.constant 0 : index
    %4 = vector.load %arg4[%c0_4, %c0_5] : memref<1x96xf32, #tpu.memory_space<vmem>>, vector<1x96xf32>
    %5 = vector.broadcast %4 : vector<1x96xf32> to vector<8x96xf32>
    %6 = arith.addf %3, %5 : vector<8x96xf32>
    %7 = arith.truncf %6 : vector<8x96xf32> to vector<8x96xbf16>
    %8 = vector.extract_strided_slice %7 {offsets = [0, 0], sizes = [8, 32], strides = [1, 1]} : vector<8x96xbf16> to vector<8x32xbf16>
    %9 = vector.shape_cast %8 : vector<8x32xbf16> to vector<8x4x8xbf16>
    %10 = tpu.transpose %9, [1, 0, 2] : vector<8x4x8xbf16> -> vector<4x8x8xbf16>
    %c0_6 = arith.constant 0 : index
    %c0_7 = arith.constant 0 : index
    %c0_8 = arith.constant 0 : index
    %c0_9 = arith.constant 0 : index
    %11 = vector.load %arg5[%c0_6, %c0_7, %c0_8, %c0_9] : memref<1x4x8x8xbf16, #tpu.memory_space<vmem>>, vector<1x4x8x8xbf16>
    %12 = vector.shape_cast %11 : vector<1x4x8x8xbf16> to vector<4x8x8xbf16>
    %13 = vector.shape_cast %10 : vector<4x8x8xbf16> to vector<1x4x8x8xbf16>
    tpu.vector_store %arg5[%c0_6, %c0_7, %c0_8, %c0_9], %13 {strides = array<i32>} : memref<1x4x8x8xbf16, #tpu.memory_space<vmem>>, vector<1x4x8x8xbf16>,
    %14 = vector.extract_strided_slice %7 {offsets = [0, 32], sizes = [8, 32], strides = [1, 1]} : vector<8x96xbf16> to vector<8x32xbf16>
    %15 = vector.shape_cast %14 : vector<8x32xbf16> to vector<8x4x8xbf16>
    %16 = tpu.transpose %15, [1, 0, 2] : vector<8x4x8xbf16> -> vector<4x8x8xbf16>
    %c0_10 = arith.constant 0 : index
    %c0_11 = arith.constant 0 : index
    %c0_12 = arith.constant 0 : index
    %c0_13 = arith.constant 0 : index
    %17 = vector.load %arg6[%c0_10, %c0_11, %c0_12, %c0_13] : memref<1x4x8x8xbf16, #tpu.memory_space<vmem>>, vector<1x4x8x8xbf16>
    %18 = vector.shape_cast %17 : vector<1x4x8x8xbf16> to vector<4x8x8xbf16>
    %19 = vector.shape_cast %16 : vector<4x8x8xbf16> to vector<1x4x8x8xbf16>
    tpu.vector_store %arg6[%c0_10, %c0_11, %c0_12, %c0_13], %19 {strides = array<i32>} : memref<1x4x8x8xbf16, #tpu.memory_space<vmem>>, vector<1x4x8x8xbf16>,
    %20 = vector.extract_strided_slice %7 {offsets = [0, 64], sizes = [8, 32], strides = [1, 1]} : vector<8x96xbf16> to vector<8x32xbf16>
    %21 = vector.shape_cast %20 : vector<8x32xbf16> to vector<8x4x8xbf16>
    %22 = tpu.transpose %21, [1, 0, 2] : vector<8x4x8xbf16> -> vector<4x8x8xbf16>
    %c0_14 = arith.constant 0 : index
    %c0_15 = arith.constant 0 : index
    %c0_16 = arith.constant 0 : index
    %c0_17 = arith.constant 0 : index
    %23 = vector.load %arg7[%c0_14, %c0_15, %c0_16, %c0_17] : memref<1x4x8x8xbf16, #tpu.memory_space<vmem>>, vector<1x4x8x8xbf16>
    %24 = vector.shape_cast %23 : vector<1x4x8x8xbf16> to vector<4x8x8xbf16>
    %25 = vector.shape_cast %22 : vector<4x8x8xbf16> to vector<1x4x8x8xbf16>
    tpu.vector_store %arg7[%c0_14, %c0_15, %c0_16, %c0_17], %25 {strides = array<i32>} : memref<1x4x8x8xbf16, #tpu.memory_space<vmem>>, vector<1x4x8x8xbf16>,
    return
  }
  func.func @transform_0(%arg0: i32, %arg1: i32) -> (i32, i32, i32) {
    %c0_i32 = arith.constant 0 : i32
    %c0_i32_0 = arith.constant 0 : i32
    return %arg0, %arg1, %c0_i32 : i32, i32, i32
  }
  func.func @transform_1(%arg0: i32, %arg1: i32) -> (i32, i32) {
    %c0_i32 = arith.constant 0 : i32
    %c0_i32_0 = arith.constant 0 : i32
    %c0_i32_1 = arith.constant 0 : i32
    return %c0_i32, %c0_i32_0 : i32, i32
  }
  func.func @transform_2(%arg0: i32, %arg1: i32) -> (i32, i32) {
    %c0_i32 = arith.constant 0 : i32
    %c0_i32_0 = arith.constant 0 : i32
    %c0_i32_1 = arith.constant 0 : i32
    return %c0_i32, %c0_i32_0 : i32, i32
  }
  func.func @transform_3(%arg0: i32, %arg1: i32) -> (i32, i32, i32, i32) {
    %c0_i32 = arith.constant 0 : i32
    %c0_i32_0 = arith.constant 0 : i32
    %c0_i32_1 = arith.constant 0 : i32
    return %arg0, %c0_i32, %arg1, %c0_i32_0 : i32, i32, i32, i32
  }
  func.func @transform_4(%arg0: i32, %arg1: i32) -> (i32, i32, i32, i32) {
    %c0_i32 = arith.constant 0 : i32
    %c0_i32_0 = arith.constant 0 : i32
    %c0_i32_1 = arith.constant 0 : i32
    return %arg0, %c0_i32, %arg1, %c0_i32_0 : i32, i32, i32, i32
  }
  func.func @transform_5(%arg0: i32, %arg1: i32) -> (i32, i32, i32, i32) {
    %c0_i32 = arith.constant 0 : i32
    %c0_i32_0 = arith.constant 0 : i32
    %c0_i32_1 = arith.constant 0 : i32
    return %arg0, %c0_i32, %arg1, %c0_i32_0 : i32, i32, i32, i32
  }
}

module attributes {stable_mosaic.version = 11 : i64} {
  func.func @_qkv_proj_kernel(%arg0: i32, %arg1: i32, %arg2: memref<1x8x32xbf16, #tpu.memory_space<vmem>>, %arg3: memref<32x96xbf16, #tpu.memory_space<vmem>>, %arg4: memref<1x96xf32, #tpu.memory_space<vmem>>, %arg5: memref<1x4x8x8xbf16, #tpu.memory_space<vmem>>, %arg6: memref<1x4x8x8xbf16, #tpu.memory_space<vmem>>, %arg7: memref<1x4x8x8xbf16, #tpu.memory_space<vmem>>) attributes {dimension_semantics = [#tpu.dimension_semantics<parallel>, #tpu.dimension_semantics<parallel>], iteration_bounds = array<i64: 2, 1>, scalar_prefetch = 0 : i64, scratch_operands = 0 : i64, tpu.core_type = #tpu.core_type<tc>, window_params = [{transform_indices = @transform_0, window_bounds = array<i64: 1, 8, 32>}, {pipeline_mode = #tpu.pipeline_mode<synchronous>, transform_indices = @transform_1, window_bounds = array<i64: 32, 96>}, {pipeline_mode = #tpu.pipeline_mode<synchronous>, transform_indices = @transform_2, window_bounds = array<i64: 1, 96>}, {transform_indices = @transform_3, window_bounds = array<i64: 1, 4, 8, 8>}, {transform_indices = @transform_4, window_bounds = array<i64: 1, 4, 8, 8>}, {transform_indices = @transform_5, window_bounds = array<i64: 1, 4, 8, 8>}]} {
    %c0 = arith.constant 0 : index
    %c0_0 = arith.constant 0 : index
    %c0_1 = arith.constant 0 : index
    %0 = vector.load %arg2[%c0, %c0_0, %c0_1] : memref<1x8x32xbf16, #tpu.memory_space<vmem>>, vector<1x8x32xbf16>
    %1 = vector.shape_cast %0 : vector<1x8x32xbf16> to vector<8x32xbf16>
    %c0_2 = arith.constant 0 : index
    %c0_3 = arith.constant 0 : index
    %2 = vector.load %arg3[%c0_2, %c0_3] : memref<32x96xbf16, #tpu.memory_space<vmem>>, vector<32x96xbf16>
    %cst = arith.constant dense<0.000000e+00> : vector<8x96xf32>
    %3 = tpu.matmul %1, %2, %cst {dimension_numbers = #tpu.dot_dimension_numbers<[1], [0], [0], [1], [0, 0, 1, 1], [], []>} : vector<8x32xbf16>, vector<32x96xbf16>, vector<8x96xf32> -> vector<8x96xf32>
    %c0_4 = arith.constant 0 : index
    %c0_5 = arith.constant 0 : index
    %4 = vector.load %arg4[%c0_4, %c0_5] : memref<1x96xf32, #tpu.memory_space<vmem>>, vector<1x96xf32>
    %5 = vector.broadcast %4 : vector<1x96xf32> to vector<8x96xf32>
    %6 = arith.addf %3, %5 : vector<8x96xf32>
    %7 = arith.truncf %6 : vector<8x96xf32> to vector<8x96xbf16>
    %8 = vector.extract_strided_slice %7 {offsets = [0, 0], sizes = [8, 32], strides = [1, 1]} : vector<8x96xbf16> to vector<8x32xbf16>
    %9 = vector.shape_cast %8 : vector<8x32xbf16> to vector<8x4x8xbf16>
    %10 = tpu.transpose %9, [1, 0, 2] : vector<8x4x8xbf16> -> vector<4x8x8xbf16>
    %c0_6 = arith.constant 0 : index
    %c0_7 = arith.constant 0 : index
    %c0_8 = arith.constant 0 : index
    %c0_9 = arith.constant 0 : index
    %11 = vector.load %arg5[%c0_6, %c0_7, %c0_8, %c0_9] : memref<1x4x8x8xbf16, #tpu.memory_space<vmem>>, vector<1x4x8x8xbf16>
    %12 = vector.shape_cast %11 : vector<1x4x8x8xbf16> to vector<4x8x8xbf16>
    %13 = vector.shape_cast %10 : vector<4x8x8xbf16> to vector<1x4x8x8xbf16>
    tpu.vector_store %arg5[%c0_6, %c0_7, %c0_8, %c0_9], %13 {strides = array<i32>} : memref<1x4x8x8xbf16, #tpu.memory_space<vmem>>, vector<1x4x8x8xbf16>,
    %14 = vector.extract_strided_slice %7 {offsets = [0, 32], sizes = [8, 32], strides = [1, 1]} : vector<8x96xbf16> to vector<8x32xbf16>
    %15 = vector.shape_cast %14 : vector<8x32xbf16> to vector<8x4x8xbf16>
    %16 = tpu.transpose %15, [1, 0, 2] : vector<8x4x8xbf16> -> vector<4x8x8xbf16>
    %c0_10 = arith.constant 0 : index
    %c0_11 = arith.constant 0 : index
    %c0_12 = arith.constant 0 : index
    %c0_13 = arith.constant 0 : index
    %17 = vector.load %arg6[%c0_10, %c0_11, %c0_12, %c0_13] : memref<1x4x8x8xbf16, #tpu.memory_space<vmem>>, vector<1x4x8x8xbf16>
    %18 = vector.shape_cast %17 : vector<1x4x8x8xbf16> to vector<4x8x8xbf16>
    %19 = vector.shape_cast %16 : vector<4x8x8xbf16> to vector<1x4x8x8xbf16>
    tpu.vector_store %arg6[%c0_10, %c0_11, %c0_12, %c0_13], %19 {strides = array<i32>} : memref<1x4x8x8xbf16, #tpu.memory_space<vmem>>, vector<1x4x8x8xbf16>,
    %20 = vector.extract_strided_slice %7 {offsets = [0, 64], sizes = [8, 32], strides = [1, 1]} : vector<8x96xbf16> to vector<8x32xbf16>
    %21 = vector.shape_cast %20 : vector<8x32xbf16> to vector<8x4x8xbf16>
    %22 = tpu.transpose %21, [1, 0, 2] : vector<8x4x8xbf16> -> vector<4x8x8xbf16>
    %c0_14 = arith.constant 0 : index
    %c0_15 = arith.constant 0 : index
    %c0_16 = arith.constant 0 : index
    %c0_17 = arith.constant 0 : index
    %23 = vector.load %arg7[%c0_14, %c0_15, %c0_16, %c0_17] : memref<1x4x8x8xbf16, #tpu.memory_space<vmem>>, vector<1x4x8x8xbf16>
    %24 = vector.shape_cast %23 : vector<1x4x8x8xbf16> to vector<4x8x8xbf16>
    %25 = vector.shape_cast %22 : vector<4x8x8xbf16> to vector<1x4x8x8xbf16>
    tpu.vector_store %arg7[%c0_14, %c0_15, %c0_16, %c0_17], %25 {strides = array<i32>} : memref<1x4x8x8xbf16, #tpu.memory_space<vmem>>, vector<1x4x8x8xbf16>,
    return
  }
  func.func @transform_0(%arg0: i32, %arg1: i32) -> (i32, i32, i32) {
    %c0_i32 = arith.constant 0 : i32
    %c0_i32_0 = arith.constant 0 : i32
    return %arg0, %arg1, %c0_i32 : i32, i32, i32
  }
  func.func @transform_1(%arg0: i32, %arg1: i32) -> (i32, i32) {
    %c0_i32 = arith.constant 0 : i32
    %c0_i32_0 = arith.constant 0 : i32
    %c0_i32_1 = arith.constant 0 : i32
    return %c0_i32, %c0_i32_0 : i32, i32
  }
  func.func @transform_2(%arg0: i32, %arg1: i32) -> (i32, i32) {
    %c0_i32 = arith.constant 0 : i32
    %c0_i32_0 = arith.constant 0 : i32
    %c0_i32_1 = arith.constant 0 : i32
    return %c0_i32, %c0_i32_0 : i32, i32
  }
  func.func @transform_3(%arg0: i32, %arg1: i32) -> (i32, i32, i32, i32) {
    %c0_i32 = arith.constant 0 : i32
    %c0_i32_0 = arith.constant 0 : i32
    %c0_i32_1 = arith.constant 0 : i32
    return %arg0, %c0_i32, %arg1, %c0_i32_0 : i32, i32, i32, i32
  }
  func.func @transform_4(%arg0: i32, %arg1: i32) -> (i32, i32, i32, i32) {
    %c0_i32 = arith.constant 0 : i32
    %c0_i32_0 = arith.constant 0 : i32
    %c0_i32_1 = arith.constant 0 : i32
    return %arg0, %c0_i32, %arg1, %c0_i32_0 : i32, i32, i32, i32
  }
  func.func @transform_5(%arg0: i32, %arg1: i32) -> (i32, i32, i32, i32) {
    %c0_i32 = arith.constant 0 : i32
    %c0_i32_0 = arith.constant 0 : i32
    %c0_i32_1 = arith.constant 0 : i32
    return %arg0, %c0_i32, %arg1, %c0_i32_0 : i32, i32, i32, i32
  }
}

</mosaic_0001>

<bundles_post_ra>
// kernel: tpu_custom_call.1
= control target key start
LH: loop header
LB: loop body
LE: loop exit
PB: predicated region body
PF: predicated region fallthrough
CT: control target
= control target key end

     0   :  { %s1651_s0 = inlined_call_operand.hbm [shape: bf16[2,8,32], index: 0, kind: input, shape index: {}]   ;;  %s1652_s1 = inlined_call_operand.hbm [shape: bf16[32,96], index: 1, kind: input, shape index: {}]   ;;  %s1653_s2 = inlined_call_operand.vmem [shape: f32[1,96], index: 2, kind: input, shape index: {}]   ;;  %s1654_s3 = inlined_call_operand.hbm [shape: bf16[2,4,8,8], index: 3, kind: output, shape index: {0}]   ;;  %s1655_s4 = inlined_call_operand.hbm [shape: bf16[2,4,8,8], index: 4, kind: output, shape index: {1}]   ;;  %s1656_s5 = inlined_call_operand.hbm [shape: bf16[2,4,8,8], index: 5, kind: output, shape index: {2}]  }
   0x1   :  { %1660 = sst [smem:[#allocation15_spill]] %s1651_s0 }
   0x2   :  { %1661 = sst [smem:[#allocation16_spill]] %s1652_s1 }
   0x3   :  { %11 = vsyncpa [#allocation3], 0 }
   0x4   :  { %13 = vsyncpa [#allocation3 + $0x1], 0 }
   0x5   :  { %14 = vsyncpa [#allocation6], 0 }
   0x6   :  { %15 = vsyncpa [#allocation4], 0 }
   0x7   :  { %17 = vsyncpa [#allocation4 + $0x1], 0 }
   0x8   :  { %18 = vsyncpa [#allocation9], 0 }
   0x9   :  { %20 = vsyncpa [#allocation9 + $0x1], 0  ;;  %s1334_s18 = smov 0   ;;  %s1336_s19 = smov 0  }
   0xa   :  { %s1338_s20 = smov 0   ;;  %s1340_s21 = smov 0  }
   0xb   :  { %s1342_s22 = smov 0   ;;  %s1344_s23 = smov 0  }
   0xc LB: > { %s1365_s24 = sadd.s32 4294967295, %s1291_s23   ;;  %p955_p0 = scmp.ge.s32.totalorder %s1291_s23, 1  ;;  %s1291_s23 = sphi %s1344_s23, %s26_s23   ;;  %s1287_s22 = sphi %s1342_s22, %s1675_s22   ;;  %s1283_s21 = sphi %s1340_s21, %s1674_s21   ;;  %s1279_s20 = sphi %s1338_s20, %s1673_s20   ;;  %s1275_s19 = sphi %s1336_s19, %s1672_s19   ;;  %s1271_s18 = sphi %s1334_s18, %s1671_s18  }
   0xd   : > { %p61_p1 = scmp.eq.s32.totalorder %s1365_s24, 0  ;;  %p197_p2 = scmp.lt.s32.totalorder %s1291_s23, 3 }
   0xe   : > { %s1662_s1 = sld [smem:[#allocation16_spill]]  ;;  %s1293_s29 = smov [#allocation5]  }
   0xf   : > { %p1373_p3 = pnand %p955_p0, %p197_p2  ;;  %s210_s30 = sshll.u32 %s1293_s29, 4  ;;  %s211_s30 = int_to_ptr.vmem [resolvable:$true] %s210_s30 }
  0x10   : > { %p957_p6 = scmp.ge.s32.totalorder %s1291_s23, 2  ;;  %s1294_s6 = smov 64  }
  0x11   : > { %p1003_p4 = pneg %p1373_p3  ;;  %s1295_s7 = smov 4  }
  0x12   : > { %s1657_s8 = sadd.s32 4294967294, %s1291_s23   ;;  %s38_s9 = sadd.s32 1, %s1287_s22 }
  0x13   : > { %p1004_p5 = pnand %p1003_p4, %p61_p1  ;;  %s47_s10 = sadd.s32 1, %s1279_s20 }
  0x14   : > { %s208_s27 = sshll.u32 %s1662_s1, 4  ;;  %p40_p7 = scmp.ge.s32.totalorder %s38_s9, 2  ;;  %s209_s27 = int_to_ptr.hbm [resolvable:$true] %s208_s27 }
  0x15   : > { %1006 = dma.hbm_to_vmem [thread:$0]  (!%p1004_p5), %s209_s27, 256, %s211_s30, [#allocation6], %s1294_s6, %s1294_s6, %s1295_s7  }
  0x16   : > { %p54_p8 = scmp.ne.s32.totalorder %s1279_s20, %s1275_s19  ;;  %p55_p9 = scmp.eq.s32.totalorder %s1291_s23, 0 }
  0x17   : > { %p60_p10 = scmp.ne.s32.totalorder %s1275_s19, %s1271_s18  ;;  %s1677_s9 = smov (%p40_p7, %s38_s9), 0 }
  0x18   : > { %p1392_p11 = por %p55_p9, %p54_p8  ;;  %s42_s13 = ssub.s32 %s1287_s22, %s1677_s9 }
  0x19   : > { %p1398_p12 = por %p61_p1, %p60_p10  ;;  %p128_p13 = scmp.eq.s32.totalorder %s1365_s24, 1 }
  0x1a   : > { %p45_p0 = scmp.eq.s32.totalorder %s42_s13, 0  ;;  %p134_p2 = scmp.eq.s32.totalorder %s1657_s8, 1 }
  0x1b   : > { %p1407_p4 = por %p128_p13, %p54_p8  ;;  %p1022_p5 = scmp.lt.s32.totalorder %s1291_s23, 2 }
  0x1c   : > { %s1413_s15 = scalar_select %p45_p0, %s1279_s20, %s47_s10  }
  0x1d   : > { %p1415_p7 = por %p134_p2, %p60_p10  ;;  %s227_s17 = sand.u32 1, %s1279_s20  }
  0x1e   : > { %s958_s25 = sshll.u32 %s227_s17, 2  ;;  %s959_s26 = sshll.u32 %s1287_s22, 2 }
  0x1f   : > { %s1668_s0 = sld [smem:[#allocation15_spill]]  ;;  %s231_s6 = scalar_lea.vmem [#allocation2], %s958_s25 }
  0x20   : > { %s240_s7 = sshll.u32 %s231_s6, 4  ;;  %p1008_p8 = pnand %p1022_p5, %p1392_p11  ;;  %s241_s7 = int_to_ptr.vmem [resolvable:$true] %s240_s7 }
  0x21   : > { %s228_s10 = scalar_lea.sflag [#allocation3], %s227_s17  ;;  %s1429_s8 = sand.u32 (!%p1373_p3), 1, %s1275_s19  }
  0x22   : > { %s961_s27 = sshll.u32 (!%p1373_p3), %s1429_s8, 2 }
  0x23   : > { %249 = sbr.rel (%p1373_p3) target bundleno = 467 (0x1d3), region = 32  ;;  %s255_s25 = scalar_lea.vmem (!%p1373_p3), [#allocation2], %s961_s27 }
  0x25   : > { %s236_s30 = scalar_lea.hbm %s1668_s0, %s959_s26  ;;  %s252_s26 = scalar_lea.sflag (!%p1373_p3), [#allocation3], %s1429_s8 }
  0x26   : > { %s238_s13 = sshll.u32 %s236_s30, 4  ;;  %s239_s13 = int_to_ptr.hbm [resolvable:$true] %s238_s13 }
  0x27   : > { %1010 = dma.hbm_to_vmem [thread:$0]  (!%p1008_p8), %s239_s13, 64, %s241_s7, %s228_s10  }
  0x28   : > { %1254 = dma.done.wait (%p1398_p12), %s252_s26, 64  }
  0x29   : > { %1256 = vsyncadd (%p1398_p12), %s252_s26, 4294967232 }
  0x2a   : > { %1258 = dma.done.wait (%p61_p1), [#allocation6], 256  }
  0x2b   : > { %1260 = vsyncadd (%p61_p1), [#allocation6], 4294967040  ;;  %v987_v0 = vld [vmem:[#allocation5 + $0x8] sm:$0xff]  ;;  %v986_v1 = vld [vmem:[#allocation5] sm:$0xff]  ;;  %vm320_vm0 = vcmask 261120   ;;  %s1658_s12 = smov 64  }
  0x2c   : > { %330 = vmatpush.bf16.msra.mxu0 %v987_v0  ;;  %v299_v2 = vld [vmem:[%s255_s25] sm:$0xf]  ;;  %s1297_s17 = smov 104   ;;  %s1298_s29 = smov 120   ;;  %v1301_v8 = vmov 1983009808  }
  0x2d   : > { %v1084_v3 = vld [vmem:[%s1653_s2] ss:$0 sm:$0xff]  ;;  %s1299_s30 = smov 96   ;;  %s1300_s6 = smov 112   ;;  %v359_v9 = vunpack.c.l.s4 %v1301_v8  ;;  %v1302_v17 = vmov 1934713408  }
  0x2e   : > { %v373_v18 = vunpack.c.l.s4 %v1302_v17  ;;  %vm368_vm1 = vcmask 1047556   ;;  %s1479_s7 = sshll.u32 %s1429_s8, 4  ;;  %vm464_vm2 = vcmask 60416   ;;  %s1490_s10 = sshll.u32 %s1283_s21, 4 }
  0x2f   : > { %v1446_v12 = vunpack.c.0.s8 %v359_v9  ;;  %s283_s13 = scalar_lea.vmem [#allocation7], %s1479_s7  ;;  %s752_s25 = scalar_lea.hbm %s1654_s3, %s1490_s10 }
  0x30   : > { %331 = vmatpush.bf16.msra.mxu0 %v986_v1  ;;  %v1451_v25 = vunpack.c.0.s8 %v373_v18  ;;  %s753_s28 = sshll.u32 %s283_s13, 4  ;;  %s755_s11 = sshll.u32 %s752_s25, 4  ;;  %s754_s28 = int_to_ptr.vmem [resolvable:$true] %s753_s28  ;;  %s756_s11 = int_to_ptr.hbm [resolvable:$true] %s755_s11 }
  0x33   : > { %974 = vmatmul.msk.bf16.vlgmr.msra.gmra.mxu0 %vm320_vm0, %v299_v2 }
  0xb0   : > { %v333_v4 = vpop.f32.mrf.mxu0 }
  0xb1   : > { %v334_v5 = vadd.f32 %v1084_v3, %v333_v4 }
  0xb3   : > { %v337_v6 = vpack.c.bf16 %v334_v5, %v334_v5 }
  0xb5   : > { %599 = vrot.lane.b32.xlu2 %v337_v6, %s1658_s12  ;;  %343 = vrot.lane.b32.xlu1 %v337_v6, %s1297_s17  ;;  %v348_v14 = vshrl.u32 %v337_v6, 16  ;;  %s730_s17 = scalar_lea.sflag [#allocation4], %s1429_s8 }
  0xb6   : > { %339 = vrot.lane.b32.xlu0 %v337_v6, %s1298_s29  ;;  %s1159_s29 = sshra.s32 %s756_s11, 4  ;;  %s1160_s29 = int_to_ptr.hbm [resolvable:$true] %s1159_s29 }
  0xb7   : > { %p1166_p10 = scmp.lt.s32.totalorder %s1160_s29, %s1654_s3 }
  0xb8   : > { %v335_v7 = vpop.f32.mrf.mxu0 }
  0xbd   : > { %469 = vrot.lane.b32.xlu1 %v337_v6, %s1299_s30 }
  0xbe   : > { %341 = vrot.lane.b32.xlu0 %v337_v6, %s1300_s6 }
 0x127   : > { %v344_v16 = vpop.permute.xlu1 %343 }
 0x128   : > { %v340_v10 = vpop.permute.xlu0 %339  ;;  %v355_v21 = vshrl.u32 %v344_v16, 16 }
 0x129   : > { %v349_v11 = vshrl.u32 %v340_v10, 16  ;;  %601 = vrot.lane.b32.xlu0 %v340_v10, %s1658_s12  ;;  %471 = vrot.lane.b32.xlu2 %v340_v10, %s1299_s30  ;;  %v347_v13 = vpack.i.b16 %v340_v10, %v337_v6 }
 0x12b   : > { %v350_v15 = vpack.i.b16 %v349_v11, %v348_v14  ;;  %v361_v19 = vperm.slane %v347_v13, %v1446_v12 }
 0x12d   : > { %v388_v22 = vperm.slane %v350_v15, %v1446_v12  ;;  %v370_v26 = vrot.slane %v361_v19, 4 }
 0x12f   : > { %v396_v29 = vrot.slane %v388_v22, 4 }
 0x130   : > { %v342_v20 = vpop.permute.xlu0 %341 }
 0x131   : > { %v353_v23 = vpack.i.b16 %v344_v16, %v342_v20  ;;  %v354_v24 = vshrl.u32 %v342_v20, 16  ;;  %475 = vrot.lane.b32.xlu2 %v344_v16, %s1299_s30  ;;  %603 = vrot.lane.b32.xlu0 %v342_v20, %s1658_s12 }
 0x132   : > { %473 = vrot.lane.b32.xlu1 %v342_v20, %s1299_s30  ;;  %s1161_s30 = scalar_lea.hbm %s1160_s29, 16 }
 0x133   : > { %v356_v27 = vpack.i.b16 %v355_v21, %v354_v24  ;;  %v366_v28 = vperm.slane %v353_v23, %v1446_v12  ;;  %p1162_p1 = scmp.ne.s32.totalorder %s1160_s29, %s1161_s30 }
 0x135   : > { %v367_v30 = vrot.slane %v366_v28, 4  ;;  %v371_v31 = vsel %vm368_vm1, %v366_v28, %v370_v26  ;;  %v393_v32 = vperm.slane %v356_v27, %v1446_v12  ;;  %p1163_p3 = pnand %p1162_p1, %p1407_p4 }
 0x136   : > { %v379_v33 = vperm.slane %v371_v31, %v1451_v25 }
 0x137   : > { %v369_v34 = vsel %vm368_vm1, %v367_v30, %v361_v19  ;;  %v394_v35 = vrot.slane %v393_v32, 4  ;;  %v397_v36 = vsel %vm368_vm1, %v393_v32, %v396_v29  ;;  %p1164_p9 = pneg %p1163_p3 }
 0x138   : > { %v375_v37 = vperm.slane %v369_v34, %v1451_v25  ;;  %v382_v38 = vrot.slane %v379_v33, 4  ;;  %v405_v39 = vperm.slane %v397_v36, %v1451_v25 }
 0x139   : > { %v395_v40 = vsel %vm368_vm1, %v394_v35, %v388_v22 }
 0x13a   : > { %v380_v41 = vrot.slane %v375_v37, 4  ;;  %v383_v42 = vsel %vm368_vm1, 0, %v382_v38  ;;  %v401_v43 = vperm.slane %v395_v40, %v1451_v25  ;;  %v408_v44 = vrot.slane %v405_v39, 4  ;;  %605 = vrot.lane.b32.xlu1 %v344_v16, %s1658_s12  ;;  %s1165_s12 = scalar_lea.hbm %s1654_s3, 32 }
 0x13b   : > { %v415_v45 = vrot.slane %v383_v42, 4  ;;  %v410_v49 = vsel %vm368_vm1, %v382_v38, %v375_v37  ;;  %p1167_p11 = scmp.lt.s32.totalorder %s1165_s12, %s1161_s30 }
 0x13c   : > { %v381_v46 = vsel %vm368_vm1, 0, %v380_v41  ;;  %v406_v47 = vrot.slane %v401_v43, 4  ;;  %v409_v48 = vsel %vm368_vm1, 0, %v408_v44  ;;  %v429_v54 = vsel %vm368_vm1, %v408_v44, %v401_v43 }
 0x13d   : > { %v416_v50 = vsel %vm368_vm1, %v415_v45, %v381_v46  ;;  %v434_v51 = vrot.slane %v409_v48, 4  ;;  %v414_v56 = vperm.slane %v410_v49, %v1446_v12  ;;  %v433_v60 = vperm.slane %v429_v54, %v1446_v12  ;;  %p1168_p12 = por %p1167_p11, %p1166_p10 }
 0x13e   : > { %v407_v52 = vsel %vm368_vm1, 0, %v406_v47  ;;  %v420_v53 = vperm.slane %v416_v50, %v1446_v12 }
 0x13f   : > { %v435_v55 = vsel %vm368_vm1, %v434_v51, %v407_v52  ;;  %p1169_p13 = pnand %p1168_p12, %p1164_p9 }
 0x140   : > { %v421_v57 = vrot.slane %v420_v53, 4  ;;  %v439_v58 = vperm.slane %v435_v55, %v1446_v12 }
 0x142   : > { %v422_v59 = vsel %vm368_vm1, %v421_v57, %v414_v56  ;;  %v440_v61 = vrot.slane %v439_v58, 4 }
 0x143   : > { %v426_v62 = vperm.slane %v422_v59, %v1451_v25 }
 0x144   : > { %v441_v63 = vsel %vm368_vm1, %v440_v61, %v433_v60 }
 0x145   : > { %v427_v0 = vrot.slane %v426_v62, 4  ;;  %v445_v1 = vperm.slane %v441_v63, %v1451_v25  ;;  %v452_v2 = vshrl.u32 %v426_v62, 16 }
 0x147   : > { %v428_v3 = vsel %vm368_vm1, 0, %v427_v0  ;;  %v446_v4 = vrot.slane %v445_v1, 4  ;;  %v450_v5 = vpack.i.b16 %v445_v1, %v426_v62  ;;  %v453_v6 = vshrl.u32 %v445_v1, 16 }
 0x148   : > { %v460_v10 = vshrl.u32 %v428_v3, 16 }
 0x149   : > { %v447_v7 = vsel %vm368_vm1, 0, %v446_v4  ;;  %v454_v8 = vpack.i.b16 %v453_v6, %v452_v2  ;;  %465 = vst.msk [vmem:[%s283_s13] sm:$0xf] %vm464_vm2, %v450_v5 }
 0x14a   : > { %v458_v9 = vpack.i.b16 %v447_v7, %v428_v3  ;;  %v461_v11 = vshrl.u32 %v447_v7, 16 }
 0x14b   : > { %466 = vst.msk [vmem:[%s283_s13 + $0x4] sm:$0xf] %vm464_vm2, %v454_v8 }
 0x14c   : > { %v462_v13 = vpack.i.b16 %v461_v11, %v460_v10  ;;  %467 = vst.msk [vmem:[%s283_s13 + $0x8] sm:$0xf] %vm464_vm2, %v458_v9 }
 0x14e   : > { %468 = vst.msk [vmem:[%s283_s13 + $0xc] sm:$0xf] %vm464_vm2, %v462_v13 }
 0x14f   : > { %1172 = shalt.err (!%p1169_p13)
}
 0x150   : > { %s1303_s8 = smov 4   ;;  %s1669_s13 = smov 64   ;;  %v600_v14 = vpop.permute.xlu2 %599  ;;  %v470_v16 = vpop.permute.xlu1 %469 }
 0x151   : > { %997 = dma.vmem_to_hbm [thread:$0]  (%p1407_p4), %s754_s28, 256, %s756_s11, %s730_s17, %s1669_s13, %s1669_s13, %s1303_s8   ;;  %v480_v18 = vshrl.u32 %v470_v16, 16  ;;  %v610_v31 = vshrl.u32 %v600_v14, 16 }
 0x152   : > { %s770_s12 = scalar_lea.hbm %s1655_s4, %s1490_s10  ;;  %s734_s27 = sand.u32 1, %s1365_s24  }
 0x153   : > { %s290_s26 = scalar_lea.vmem [#allocation8], %s1479_s7  ;;  %s1567_s28 = sshll.u32 %s770_s12, 4  ;;  %s774_s28 = int_to_ptr.hbm [resolvable:$true] %s1567_s28 }
 0x154   : > { %s771_s25 = sshll.u32 %s290_s26, 4  ;;  %s1580_s24 = scalar_lea.sflag [#allocation9], %s734_s27  ;;  %s772_s25 = int_to_ptr.vmem [resolvable:$true] %s771_s25 }
 0x155   : > { %s1187_s11 = sshra.s32 %s774_s28, 4  ;;  %s1193_s21 = scalar_lea.hbm %s1655_s4, 32  ;;  %s1188_s11 = int_to_ptr.hbm [resolvable:$true] %s1187_s11 }
 0x156   : > { %s1189_s17 = scalar_lea.hbm %s1188_s11, 16  ;;  %p1194_p8 = scmp.lt.s32.totalorder %s1188_s11, %s1655_s4 }
 0x157   : > { %p1190_p0 = scmp.ne.s32.totalorder %s1188_s11, %s1189_s17  ;;  %p1195_p1 = scmp.lt.s32.totalorder %s1193_s21, %s1189_s17 }
 0x159   : > { %p1191_p2 = pnand %p1190_p0, %p1407_p4  ;;  %p1196_p3 = por %p1195_p1, %p1194_p8 }
 0x15b   : > { %p1192_p5 = pneg %p1191_p2 }
 0x15d   : > { %p1197_p9 = pnand %p1196_p3, %p1192_p5 }
 0x183   : > { %v472_v15 = vpop.permute.xlu2 %471 }
 0x184   : > { %v481_v17 = vshrl.u32 %v472_v15, 16  ;;  %v479_v19 = vpack.i.b16 %v472_v15, %v470_v16 }
 0x186   : > { %v482_v21 = vpack.i.b16 %v481_v17, %v480_v18  ;;  %v493_v23 = vperm.slane %v479_v19, %v1446_v12 }
 0x188   : > { %v519_v27 = vperm.slane %v482_v21, %v1446_v12  ;;  %v501_v32 = vrot.slane %v493_v23, 4 }
 0x18a   : > { %v527_v37 = vrot.slane %v519_v27, 4 }
 0x18b   : > { %v476_v22 = vpop.permute.xlu2 %475 }
 0x18c   : > { %v487_v28 = vshrl.u32 %v476_v22, 16 }
 0x19b   : > { %v602_v20 = vpop.permute.xlu0 %601 }
 0x19c   : > { %v611_v24 = vshrl.u32 %v602_v20, 16  ;;  %v609_v33 = vpack.i.b16 %v602_v20, %v600_v14 }
 0x19e   : > { %v612_v36 = vpack.i.b16 %v611_v24, %v610_v31  ;;  %v623_v43 = vperm.slane %v609_v33, %v1446_v12 }
 0x1a0   : > { %v649_v47 = vperm.slane %v612_v36, %v1446_v12  ;;  %v631_v60 = vrot.slane %v623_v43, 4 }
 0x1a2   : > { %v657_v0 = vrot.slane %v649_v47, 4 }
 0x1a3   : > { %v604_v42 = vpop.permute.xlu0 %603 }
 0x1a4   : > { %v474_v26 = vpop.permute.xlu1 %473  ;;  %v616_v53 = vshrl.u32 %v604_v42, 16 }
 0x1a5   : > { %v485_v29 = vpack.i.b16 %v476_v22, %v474_v26  ;;  %v486_v30 = vshrl.u32 %v474_v26, 16 }
 0x1a7   : > { %v488_v34 = vpack.i.b16 %v487_v28, %v486_v30  ;;  %v498_v35 = vperm.slane %v485_v29, %v1446_v12 }
 0x1a9   : > { %v499_v38 = vrot.slane %v498_v35, 4  ;;  %v502_v39 = vsel %vm368_vm1, %v498_v35, %v501_v32  ;;  %v524_v40 = vperm.slane %v488_v34, %v1446_v12 }
 0x1aa   : > { %v510_v41 = vperm.slane %v502_v39, %v1451_v25 }
 0x1ab   : > { %v500_v44 = vsel %vm368_vm1, %v499_v38, %v493_v23  ;;  %v525_v45 = vrot.slane %v524_v40, 4  ;;  %v528_v46 = vsel %vm368_vm1, %v524_v40, %v527_v37 }
 0x1ac   : > { %v506_v48 = vperm.slane %v500_v44, %v1451_v25  ;;  %v513_v49 = vrot.slane %v510_v41, 4  ;;  %v536_v50 = vperm.slane %v528_v46, %v1451_v25  ;;  %v606_v51 = vpop.permute.xlu1 %605 }
 0x1ad   : > { %v526_v52 = vsel %vm368_vm1, %v525_v45, %v519_v27  ;;  %v615_v54 = vpack.i.b16 %v606_v51, %v604_v42  ;;  %v617_v55 = vshrl.u32 %v606_v51, 16 }
 0x1ae   : > { %v511_v56 = vrot.slane %v506_v48, 4  ;;  %v514_v57 = vsel %vm368_vm1, 0, %v513_v49  ;;  %v532_v58 = vperm.slane %v526_v52, %v1451_v25  ;;  %v539_v59 = vrot.slane %v536_v50, 4 }
 0x1af   : > { %v546_v61 = vrot.slane %v514_v57, 4  ;;  %v618_v62 = vpack.i.b16 %v617_v55, %v616_v53  ;;  %v628_v63 = vperm.slane %v615_v54, %v1446_v12  ;;  %v541_v4 = vsel %vm368_vm1, %v513_v49, %v506_v48 }
 0x1b0   : > { %v512_v1 = vsel %vm368_vm1, 0, %v511_v56  ;;  %v537_v2 = vrot.slane %v532_v58, 4  ;;  %v540_v3 = vsel %vm368_vm1, 0, %v539_v59  ;;  %v560_v10 = vsel %vm368_vm1, %v539_v59, %v532_v58 }
 0x1b1   : > { %v547_v5 = vsel %vm368_vm1, %v546_v61, %v512_v1  ;;  %v565_v6 = vrot.slane %v540_v3, 4  ;;  %v629_v7 = vrot.slane %v628_v63, 4  ;;  %v632_v11 = vsel %vm368_vm1, %v628_v63, %v631_v60 }
 0x1b2   : > { %v538_v8 = vsel %vm368_vm1, 0, %v537_v2  ;;  %v551_v9 = vperm.slane %v547_v5, %v1446_v12  ;;  %v640_v15 = vperm.slane %v632_v11, %v1451_v25  ;;  %v654_v16 = vperm.slane %v618_v62, %v1446_v12 }
 0x1b3   : > { %v566_v13 = vsel %vm368_vm1, %v565_v6, %v538_v8  ;;  %v630_v14 = vsel %vm368_vm1, %v629_v7, %v623_v43  ;;  %v545_v17 = vperm.slane %v541_v4, %v1446_v12  ;;  %v564_v21 = vperm.slane %v560_v10, %v1446_v12 }
 0x1b4   : > { %v552_v18 = vrot.slane %v551_v9, 4  ;;  %v570_v19 = vperm.slane %v566_v13, %v1446_v12  ;;  %v636_v20 = vperm.slane %v630_v14, %v1451_v25  ;;  %v643_v22 = vrot.slane %v640_v15, 4 }
 0x1b5   : > { %v655_v23 = vrot.slane %v654_v16, 4  ;;  %v658_v24 = vsel %vm368_vm1, %v654_v16, %v657_v0 }
 0x1b6   : > { %v553_v26 = vsel %vm368_vm1, %v552_v18, %v545_v17  ;;  %v571_v27 = vrot.slane %v570_v19, 4  ;;  %v641_v28 = vrot.slane %v636_v20, 4  ;;  %v666_v29 = vperm.slane %v658_v24, %v1451_v25 }
 0x1b7   : > { %v557_v30 = vperm.slane %v553_v26, %v1451_v25  ;;  %v644_v31 = vsel %vm368_vm1, 0, %v643_v22  ;;  %v656_v32 = vsel %vm368_vm1, %v655_v23, %v649_v47  ;;  %v671_v48 = vsel %vm368_vm1, %v643_v22, %v636_v20 }
 0x1b8   : > { %v572_v33 = vsel %vm368_vm1, %v571_v27, %v564_v21  ;;  %v662_v34 = vperm.slane %v656_v32, %v1451_v25  ;;  %v669_v35 = vrot.slane %v666_v29, 4  ;;  %v642_v38 = vsel %vm368_vm1, 0, %v641_v28 }
 0x1b9   : > { %v558_v36 = vrot.slane %v557_v30, 4  ;;  %v576_v37 = vperm.slane %v572_v33, %v1451_v25  ;;  %v583_v39 = vshrl.u32 %v557_v30, 16  ;;  %v676_v42 = vrot.slane %v644_v31, 4 }
 0x1ba   : > { %v667_v40 = vrot.slane %v662_v34, 4  ;;  %v670_v41 = vsel %vm368_vm1, 0, %v669_v35  ;;  %v675_v57 = vperm.slane %v671_v48, %v1446_v12  ;;  %v690_v59 = vsel %vm368_vm1, %v669_v35, %v662_v34 }
 0x1bb   : > { %v559_v43 = vsel %vm368_vm1, 0, %v558_v36  ;;  %v577_v44 = vrot.slane %v576_v37, 4  ;;  %v581_v45 = vpack.i.b16 %v576_v37, %v557_v30  ;;  %v584_v46 = vshrl.u32 %v576_v37, 16 }
 0x1bc   : > { %v668_v47 = vsel %vm368_vm1, 0, %v667_v40  ;;  %v677_v49 = vsel %vm368_vm1, %v676_v42, %v642_v38  ;;  %v695_v53 = vrot.slane %v670_v41, 4  ;;  %v591_v55 = vshrl.u32 %v559_v43, 16 }
 0x1bd   : > { %v578_v50 = vsel %vm368_vm1, 0, %v577_v44  ;;  %v585_v51 = vpack.i.b16 %v584_v46, %v583_v39  ;;  %v681_v52 = vperm.slane %v677_v49, %v1446_v12  ;;  %595 = vst.msk [vmem:[%s290_s26] sm:$0xf] %vm464_vm2, %v581_v45  ;;  %v694_v1 = vperm.slane %v690_v59, %v1446_v12 }
 0x1be   : > { %v589_v54 = vpack.i.b16 %v578_v50, %v559_v43  ;;  %v592_v56 = vshrl.u32 %v578_v50, 16  ;;  %v696_v60 = vsel %vm368_vm1, %v695_v53, %v668_v47 }
 0x1bf   : > { %v682_v58 = vrot.slane %v681_v52, 4  ;;  %596 = vst.msk [vmem:[%s290_s26 + $0x4] sm:$0xf] %vm464_vm2, %v585_v51  ;;  %v700_v62 = vperm.slane %v696_v60, %v1446_v12 }
 0x1c0   : > { %v593_v61 = vpack.i.b16 %v592_v56, %v591_v55  ;;  %597 = vst.msk [vmem:[%s290_s26 + $0x8] sm:$0xf] %vm464_vm2, %v589_v54 }
 0x1c1   : > { %v683_v63 = vsel %vm368_vm1, %v682_v58, %v675_v57  ;;  %v701_v2 = vrot.slane %v700_v62, 4 }
 0x1c2   : > { %v687_v0 = vperm.slane %v683_v63, %v1451_v25  ;;  %598 = vst.msk [vmem:[%s290_s26 + $0xc] sm:$0xf] %vm464_vm2, %v593_v61 }
 0x1c3   : > { %1200 = shalt.err (!%p1197_p9)
}
 0x1c4   : > { %998 = dma.vmem_to_hbm [thread:$0]  (%p1407_p4), %s772_s25, 256, %s774_s28, %s1580_s24, %s1669_s13, %s1669_s13, %s1303_s8   ;;  %v688_v12 = vrot.slane %v687_v0, 4  ;;  %v702_v3 = vsel %vm368_vm1, %v701_v2, %v694_v1  ;;  %v713_v5 = vshrl.u32 %v687_v0, 16 }
 0x1c5   : > { %v706_v4 = vperm.slane %v702_v3, %v1451_v25  ;;  %s788_s27 = scalar_lea.hbm %s1656_s5, %s1490_s10  ;;  %s297_s25 = scalar_lea.vmem [#allocation10], %s1479_s7 }
 0x1c6   : > { %v689_v6 = vsel %vm368_vm1, 0, %v688_v12  ;;  %s1604_s26 = sshll.u32 %s788_s27, 4  ;;  %s789_s28 = sshll.u32 %s297_s25, 4  ;;  %s790_s28 = int_to_ptr.vmem [resolvable:$true] %s789_s28  ;;  %s792_s26 = int_to_ptr.hbm [resolvable:$true] %s1604_s26 }
 0x1c7   : > { %v707_v7 = vrot.slane %v706_v4, 4  ;;  %v711_v8 = vpack.i.b16 %v706_v4, %v687_v0  ;;  %v714_v9 = vshrl.u32 %v706_v4, 16  ;;  %v721_v13 = vshrl.u32 %v689_v6, 16  ;;  %s1215_s10 = sshra.s32 %s792_s26, 4  ;;  %s1221_s29 = scalar_lea.hbm %s1656_s5, 32  ;;  %s1216_s10 = int_to_ptr.hbm [resolvable:$true] %s1215_s10 }
 0x1c8   : > { %s1217_s11 = scalar_lea.hbm %s1216_s10, 16  ;;  %p1222_p13 = scmp.lt.s32.totalorder %s1216_s10, %s1656_s5 }
 0x1c9   : > { %v708_v10 = vsel %vm368_vm1, 0, %v707_v7  ;;  %v715_v11 = vpack.i.b16 %v714_v9, %v713_v5  ;;  %725 = vst.msk [vmem:[%s297_s25] sm:$0xf] %vm464_vm2, %v711_v8  ;;  %p1218_p10 = scmp.ne.s32.totalorder %s1216_s10, %s1217_s11  ;;  %p1223_p0 = scmp.lt.s32.totalorder %s1221_s29, %s1217_s11 }
 0x1ca   : > { %v719_v25 = vpack.i.b16 %v708_v10, %v689_v6  ;;  %v722_v14 = vshrl.u32 %v708_v10, 16 }
 0x1cb   : > { %726 = vst.msk [vmem:[%s297_s25 + $0x4] sm:$0xf] %vm464_vm2, %v715_v11  ;;  %p1219_p11 = pnand %p1218_p10, %p1407_p4  ;;  %p1224_p2 = por %p1223_p0, %p1222_p13 }
 0x1cc   : > { %v723_v15 = vpack.i.b16 %v722_v14, %v721_v13  ;;  %727 = vst.msk [vmem:[%s297_s25 + $0x8] sm:$0xf] %vm464_vm2, %v719_v25 }
 0x1cd   : > { %p1220_p12 = pneg %p1219_p11 }
 0x1ce   : > { %728 = vst.msk [vmem:[%s297_s25 + $0xc] sm:$0xf] %vm464_vm2, %v723_v15 }
 0x1cf   : > { %p1225_p5 = pnand %p1224_p2, %p1220_p12 }
 0x1d1   : > { %1228 = shalt.err (!%p1225_p5)
}
 0x1d2   : > { %999 = dma.vmem_to_hbm [thread:$0]  (%p1407_p4), %s790_s28, 256, %s792_s26, %s1580_s24, %s1669_s13, %s1669_s13, %s1303_s8  }
 0x1d3 PF: > { %s806_s6 = sand.u32 1, %s1271_s18   ;;  %p1012_p8 = pnand %p957_p6, %p1415_p7 }
 0x1d4   : > { %s807_s0 = scalar_lea.sflag [#allocation4], %s806_s6 }
 0x1d5   : > { %p1013_p1 = pneg %p1012_p8 }
 0x1d7   : > { %1262 = dma.done.wait (%p1013_p1), %s807_s0, 256  }
 0x1d8   : > { %1264 = vsyncadd (%p1013_p1), %s807_s0, 4294967040  ;;  %s1670_s1 = sadd.s32 4294967294, %s1291_s23  }
 0x1d9   : > { %s816_s14 = sand.u32 1, %s1670_s1  }
 0x1da   : > { %s817_s12 = scalar_lea.sflag [#allocation9], %s816_s14 }
 0x1db   : > { %1266 = dma.done.wait (%p1013_p1), %s817_s12, 512  }
 0x1dc   : > { %1268 = vsyncadd (%p1013_p1), %s817_s12, 4294966784  ;;  %s26_s23 = sadd.s32 1, %s1291_s23   ;;  %s1671_s18 = smov %s1275_s19 }
 0x1dd   : > { %p23_p4 = scmp.ge.s32.totalorder %s26_s23, 4   ;;  %s1672_s19 = smov %s1279_s20 }
 0x1de   : > { %s1673_s20 = smov %s1413_s15  ;;  %s1674_s21 = smov %s1287_s22 }
 0x1df   : > { %s1675_s22 = smov %s1677_s9  ;;  %25 = sbr.rel (!%p23_p4) target bundleno = 12 (0xc), region = 113 }
 0x1e4   :  { %833 = vsyncpa [#allocation3], 1 }
 0x1e5   :  { %835 = vsyncpa [#allocation3 + $0x1], 1 }
 0x1e6   :  { %836 = vsyncpa [#allocation6], 1 }
 0x1e7   :  { %837 = vsyncpa [#allocation4], 1 }
 0x1e8   :  { %839 = vsyncpa [#allocation4 + $0x1], 1 }
 0x1e9   :  { %840 = vsyncpa [#allocation9], 1 }
 0x1ea   :  { %842 = vsyncpa [#allocation9 + $0x1], 1 }

// kernel: tpu_custom_call.1
= control target key start
LH: loop header
LB: loop body
LE: loop exit
PB: predicated region body
PF: predicated region fallthrough
CT: control target
= control target key end

     0   :  { %s1651_s0 = inlined_call_operand.hbm [shape: bf16[2,8,32], index: 0, kind: input, shape index: {}]   ;;  %s1652_s1 = inlined_call_operand.hbm [shape: bf16[32,96], index: 1, kind: input, shape index: {}]   ;;  %s1653_s2 = inlined_call_operand.vmem [shape: f32[1,96], index: 2, kind: input, shape index: {}]   ;;  %s1654_s3 = inlined_call_operand.hbm [shape: bf16[2,4,8,8], index: 3, kind: output, shape index: {0}]   ;;  %s1655_s4 = inlined_call_operand.hbm [shape: bf16[2,4,8,8], index: 4, kind: output, shape index: {1}]   ;;  %s1656_s5 = inlined_call_operand.hbm [shape: bf16[2,4,8,8], index: 5, kind: output, shape index: {2}]  }
   0x1   :  { %1660 = sst [smem:[#allocation15_spill]] %s1651_s0 }
   0x2   :  { %1661 = sst [smem:[#allocation16_spill]] %s1652_s1 }
   0x3   :  { %11 = vsyncpa [#allocation3], 0 }
   0x4   :  { %13 = vsyncpa [#allocation3 + $0x1], 0 }
   0x5   :  { %14 = vsyncpa [#allocation6], 0 }
   0x6   :  { %15 = vsyncpa [#allocation4], 0 }
   0x7   :  { %17 = vsyncpa [#allocation4 + $0x1], 0 }
   0x8   :  { %18 = vsyncpa [#allocation9], 0 }
   0x9   :  { %20 = vsyncpa [#allocation9 + $0x1], 0  ;;  %s1334_s18 = smov 0   ;;  %s1336_s19 = smov 0  }
   0xa   :  { %s1338_s20 = smov 0   ;;  %s1340_s21 = smov 0  }
   0xb   :  { %s1342_s22 = smov 0   ;;  %s1344_s23 = smov 0  }
   0xc LB: > { %s1365_s24 = sadd.s32 4294967295, %s1291_s23   ;;  %p955_p0 = scmp.ge.s32.totalorder %s1291_s23, 1  ;;  %s1291_s23 = sphi %s1344_s23, %s26_s23   ;;  %s1287_s22 = sphi %s1342_s22, %s1675_s22   ;;  %s1283_s21 = sphi %s1340_s21, %s1674_s21   ;;  %s1279_s20 = sphi %s1338_s20, %s1673_s20   ;;  %s1275_s19 = sphi %s1336_s19, %s1672_s19   ;;  %s1271_s18 = sphi %s1334_s18, %s1671_s18  }
   0xd   : > { %p61_p1 = scmp.eq.s32.totalorder %s1365_s24, 0  ;;  %p197_p2 = scmp.lt.s32.totalorder %s1291_s23, 3 }
   0xe   : > { %s1662_s1 = sld [smem:[#allocation16_spill]]  ;;  %s1293_s29 = smov [#allocation5]  }
   0xf   : > { %p1373_p3 = pnand %p955_p0, %p197_p2  ;;  %s210_s30 = sshll.u32 %s1293_s29, 4  ;;  %s211_s30 = int_to_ptr.vmem [resolvable:$true] %s210_s30 }
  0x10   : > { %p957_p6 = scmp.ge.s32.totalorder %s1291_s23, 2  ;;  %s1294_s6 = smov 64  }
  0x11   : > { %p1003_p4 = pneg %p1373_p3  ;;  %s1295_s7 = smov 4  }
  0x12   : > { %s1657_s8 = sadd.s32 4294967294, %s1291_s23   ;;  %s38_s9 = sadd.s32 1, %s1287_s22 }
  0x13   : > { %p1004_p5 = pnand %p1003_p4, %p61_p1  ;;  %s47_s10 = sadd.s32 1, %s1279_s20 }
  0x14   : > { %s208_s27 = sshll.u32 %s1662_s1, 4  ;;  %p40_p7 = scmp.ge.s32.totalorder %s38_s9, 2  ;;  %s209_s27 = int_to_ptr.hbm [resolvable:$true] %s208_s27 }
  0x15   : > { %1006 = dma.hbm_to_vmem [thread:$0]  (!%p1004_p5), %s209_s27, 256, %s211_s30, [#allocation6], %s1294_s6, %s1294_s6, %s1295_s7  }
  0x16   : > { %p54_p8 = scmp.ne.s32.totalorder %s1279_s20, %s1275_s19  ;;  %p55_p9 = scmp.eq.s32.totalorder %s1291_s23, 0 }
  0x17   : > { %p60_p10 = scmp.ne.s32.totalorder %s1275_s19, %s1271_s18  ;;  %s1677_s9 = smov (%p40_p7, %s38_s9), 0 }
  0x18   : > { %p1392_p11 = por %p55_p9, %p54_p8  ;;  %s42_s13 = ssub.s32 %s1287_s22, %s1677_s9 }
  0x19   : > { %p1398_p12 = por %p61_p1, %p60_p10  ;;  %p128_p13 = scmp.eq.s32.totalorder %s1365_s24, 1 }
  0x1a   : > { %p45_p0 = scmp.eq.s32.totalorder %s42_s13, 0  ;;  %p134_p2 = scmp.eq.s32.totalorder %s1657_s8, 1 }
  0x1b   : > { %p1407_p4 = por %p128_p13, %p54_p8  ;;  %p1022_p5 = scmp.lt.s32.totalorder %s1291_s23, 2 }
  0x1c   : > { %s1413_s15 = scalar_select %p45_p0, %s1279_s20, %s47_s10  }
  0x1d   : > { %p1415_p7 = por %p134_p2, %p60_p10  ;;  %s227_s17 = sand.u32 1, %s1279_s20  }
  0x1e   : > { %s958_s25 = sshll.u32 %s227_s17, 2  ;;  %s959_s26 = sshll.u32 %s1287_s22, 2 }
  0x1f   : > { %s1668_s0 = sld [smem:[#allocation15_spill]]  ;;  %s231_s6 = scalar_lea.vmem [#allocation2], %s958_s25 }
  0x20   : > { %s240_s7 = sshll.u32 %s231_s6, 4  ;;  %p1008_p8 = pnand %p1022_p5, %p1392_p11  ;;  %s241_s7 = int_to_ptr.vmem [resolvable:$true] %s240_s7 }
  0x21   : > { %s228_s10 = scalar_lea.sflag [#allocation3], %s227_s17  ;;  %s1429_s8 = sand.u32 (!%p1373_p3), 1, %s1275_s19  }
  0x22   : > { %s961_s27 = sshll.u32 (!%p1373_p3), %s1429_s8, 2 }
  0x23   : > { %249 = sbr.rel (%p1373_p3) target bundleno = 467 (0x1d3), region = 32  ;;  %s255_s25 = scalar_lea.vmem (!%p1373_p3), [#allocation2], %s961_s27 }
  0x25   : > { %s236_s30 = scalar_lea.hbm %s1668_s0, %s959_s26  ;;  %s252_s26 = scalar_lea.sflag (!%p1373_p3), [#allocation3], %s1429_s8 }
  0x26   : > { %s238_s13 = sshll.u32 %s236_s30, 4  ;;  %s239_s13 = int_to_ptr.hbm [resolvable:$true] %s238_s13 }
  0x27   : > { %1010 = dma.hbm_to_vmem [thread:$0]  (!%p1008_p8), %s239_s13, 64, %s241_s7, %s228_s10  }
  0x28   : > { %1254 = dma.done.wait (%p1398_p12), %s252_s26, 64  }
  0x29   : > { %1256 = vsyncadd (%p1398_p12), %s252_s26, 4294967232 }
  0x2a   : > { %1258 = dma.done.wait (%p61_p1), [#allocation6], 256  }
  0x2b   : > { %1260 = vsyncadd (%p61_p1), [#allocation6], 4294967040  ;;  %v987_v0 = vld [vmem:[#allocation5 + $0x8] sm:$0xff]  ;;  %v986_v1 = vld [vmem:[#allocation5] sm:$0xff]  ;;  %vm320_vm0 = vcmask 261120   ;;  %s1658_s12 = smov 64  }
  0x2c   : > { %330 = vmatpush.bf16.msra.mxu0 %v987_v0  ;;  %v299_v2 = vld [vmem:[%s255_s25] sm:$0xf]  ;;  %s1297_s17 = smov 104   ;;  %s1298_s29 = smov 120   ;;  %v1301_v8 = vmov 1983009808  }
  0x2d   : > { %v1084_v3 = vld [vmem:[%s1653_s2] ss:$0 sm:$0xff]  ;;  %s1299_s30 = smov 96   ;;  %s1300_s6 = smov 112   ;;  %v359_v9 = vunpack.c.l.s4 %v1301_v8  ;;  %v1302_v17 = vmov 1934713408  }
  0x2e   : > { %v373_v18 = vunpack.c.l.s4 %v1302_v17  ;;  %vm368_vm1 = vcmask 1047556   ;;  %s1479_s7 = sshll.u32 %s1429_s8, 4  ;;  %vm464_vm2 = vcmask 60416   ;;  %s1490_s10 = sshll.u32 %s1283_s21, 4 }
  0x2f   : > { %v1446_v12 = vunpack.c.0.s8 %v359_v9  ;;  %s283_s13 = scalar_lea.vmem [#allocation7], %s1479_s7  ;;  %s752_s25 = scalar_lea.hbm %s1654_s3, %s1490_s10 }
  0x30   : > { %331 = vmatpush.bf16.msra.mxu0 %v986_v1  ;;  %v1451_v25 = vunpack.c.0.s8 %v373_v18  ;;  %s753_s28 = sshll.u32 %s283_s13, 4  ;;  %s755_s11 = sshll.u32 %s752_s25, 4  ;;  %s754_s28 = int_to_ptr.vmem [resolvable:$true] %s753_s28  ;;  %s756_s11 = int_to_ptr.hbm [resolvable:$true] %s755_s11 }
  0x33   : > { %974 = vmatmul.msk.bf16.vlgmr.msra.gmra.mxu0 %vm320_vm0, %v299_v2 }
  0xb0   : > { %v333_v4 = vpop.f32.mrf.mxu0 }
  0xb1   : > { %v334_v5 = vadd.f32 %v1084_v3, %v333_v4 }
  0xb3   : > { %v337_v6 = vpack.c.bf16 %v334_v5, %v334_v5 }
  0xb5   : > { %599 = vrot.lane.b32.xlu2 %v337_v6, %s1658_s12  ;;  %343 = vrot.lane.b32.xlu1 %v337_v6, %s1297_s17  ;;  %v348_v14 = vshrl.u32 %v337_v6, 16  ;;  %s730_s17 = scalar_lea.sflag [#allocation4], %s1429_s8 }
  0xb6   : > { %339 = vrot.lane.b32.xlu0 %v337_v6, %s1298_s29  ;;  %s1159_s29 = sshra.s32 %s756_s11, 4  ;;  %s1160_s29 = int_to_ptr.hbm [resolvable:$true] %s1159_s29 }
  0xb7   : > { %p1166_p10 = scmp.lt.s32.totalorder %s1160_s29, %s1654_s3 }
  0xb8   : > { %v335_v7 = vpop.f32.mrf.mxu0 }
  0xbd   : > { %469 = vrot.lane.b32.xlu1 %v337_v6, %s1299_s30 }
  0xbe   : > { %341 = vrot.lane.b32.xlu0 %v337_v6, %s1300_s6 }
 0x127   : > { %v344_v16 = vpop.permute.xlu1 %343 }
 0x128   : > { %v340_v10 = vpop.permute.xlu0 %339  ;;  %v355_v21 = vshrl.u32 %v344_v16, 16 }
 0x129   : > { %v349_v11 = vshrl.u32 %v340_v10, 16  ;;  %601 = vrot.lane.b32.xlu0 %v340_v10, %s1658_s12  ;;  %471 = vrot.lane.b32.xlu2 %v340_v10, %s1299_s30  ;;  %v347_v13 = vpack.i.b16 %v340_v10, %v337_v6 }
 0x12b   : > { %v350_v15 = vpack.i.b16 %v349_v11, %v348_v14  ;;  %v361_v19 = vperm.slane %v347_v13, %v1446_v12 }
 0x12d   : > { %v388_v22 = vperm.slane %v350_v15, %v1446_v12  ;;  %v370_v26 = vrot.slane %v361_v19, 4 }
 0x12f   : > { %v396_v29 = vrot.slane %v388_v22, 4 }
 0x130   : > { %v342_v20 = vpop.permute.xlu0 %341 }
 0x131   : > { %v353_v23 = vpack.i.b16 %v344_v16, %v342_v20  ;;  %v354_v24 = vshrl.u32 %v342_v20, 16  ;;  %475 = vrot.lane.b32.xlu2 %v344_v16, %s1299_s30  ;;  %603 = vrot.lane.b32.xlu0 %v342_v20, %s1658_s12 }
 0x132   : > { %473 = vrot.lane.b32.xlu1 %v342_v20, %s1299_s30  ;;  %s1161_s30 = scalar_lea.hbm %s1160_s29, 16 }
 0x133   : > { %v356_v27 = vpack.i.b16 %v355_v21, %v354_v24  ;;  %v366_v28 = vperm.slane %v353_v23, %v1446_v12  ;;  %p1162_p1 = scmp.ne.s32.totalorder %s1160_s29, %s1161_s30 }
 0x135   : > { %v367_v30 = vrot.slane %v366_v28, 4  ;;  %v371_v31 = vsel %vm368_vm1, %v366_v28, %v370_v26  ;;  %v393_v32 = vperm.slane %v356_v27, %v1446_v12  ;;  %p1163_p3 = pnand %p1162_p1, %p1407_p4 }
 0x136   : > { %v379_v33 = vperm.slane %v371_v31, %v1451_v25 }
 0x137   : > { %v369_v34 = vsel %vm368_vm1, %v367_v30, %v361_v19  ;;  %v394_v35 = vrot.slane %v393_v32, 4  ;;  %v397_v36 = vsel %vm368_vm1, %v393_v32, %v396_v29  ;;  %p1164_p9 = pneg %p1163_p3 }
 0x138   : > { %v375_v37 = vperm.slane %v369_v34, %v1451_v25  ;;  %v382_v38 = vrot.slane %v379_v33, 4  ;;  %v405_v39 = vperm.slane %v397_v36, %v1451_v25 }
 0x139   : > { %v395_v40 = vsel %vm368_vm1, %v394_v35, %v388_v22 }
 0x13a   : > { %v380_v41 = vrot.slane %v375_v37, 4  ;;  %v383_v42 = vsel %vm368_vm1, 0, %v382_v38  ;;  %v401_v43 = vperm.slane %v395_v40, %v1451_v25  ;;  %v408_v44 = vrot.slane %v405_v39, 4  ;;  %605 = vrot.lane.b32.xlu1 %v344_v16, %s1658_s12  ;;  %s1165_s12 = scalar_lea.hbm %s1654_s3, 32 }
 0x13b   : > { %v415_v45 = vrot.slane %v383_v42, 4  ;;  %v410_v49 = vsel %vm368_vm1, %v382_v38, %v375_v37  ;;  %p1167_p11 = scmp.lt.s32.totalorder %s1165_s12, %s1161_s30 }
 0x13c   : > { %v381_v46 = vsel %vm368_vm1, 0, %v380_v41  ;;  %v406_v47 = vrot.slane %v401_v43, 4  ;;  %v409_v48 = vsel %vm368_vm1, 0, %v408_v44  ;;  %v429_v54 = vsel %vm368_vm1, %v408_v44, %v401_v43 }
 0x13d   : > { %v416_v50 = vsel %vm368_vm1, %v415_v45, %v381_v46  ;;  %v434_v51 = vrot.slane %v409_v48, 4  ;;  %v414_v56 = vperm.slane %v410_v49, %v1446_v12  ;;  %v433_v60 = vperm.slane %v429_v54, %v1446_v12  ;;  %p1168_p12 = por %p1167_p11, %p1166_p10 }
 0x13e   : > { %v407_v52 = vsel %vm368_vm1, 0, %v406_v47  ;;  %v420_v53 = vperm.slane %v416_v50, %v1446_v12 }
 0x13f   : > { %v435_v55 = vsel %vm368_vm1, %v434_v51, %v407_v52  ;;  %p1169_p13 = pnand %p1168_p12, %p1164_p9 }
 0x140   : > { %v421_v57 = vrot.slane %v420_v53, 4  ;;  %v439_v58 = vperm.slane %v435_v55, %v1446_v12 }
 0x142   : > { %v422_v59 = vsel %vm368_vm1, %v421_v57, %v414_v56  ;;  %v440_v61 = vrot.slane %v439_v58, 4 }
 0x143   : > { %v426_v62 = vperm.slane %v422_v59, %v1451_v25 }
 0x144   : > { %v441_v63 = vsel %vm368_vm1, %v440_v61, %v433_v60 }
 0x145   : > { %v427_v0 = vrot.slane %v426_v62, 4  ;;  %v445_v1 = vperm.slane %v441_v63, %v1451_v25  ;;  %v452_v2 = vshrl.u32 %v426_v62, 16 }
 0x147   : > { %v428_v3 = vsel %vm368_vm1, 0, %v427_v0  ;;  %v446_v4 = vrot.slane %v445_v1, 4  ;;  %v450_v5 = vpack.i.b16 %v445_v1, %v426_v62  ;;  %v453_v6 = vshrl.u32 %v445_v1, 16 }
 0x148   : > { %v460_v10 = vshrl.u32 %v428_v3, 16 }
 0x149   : > { %v447_v7 = vsel %vm368_vm1, 0, %v446_v4  ;;  %v454_v8 = vpack.i.b16 %v453_v6, %v452_v2  ;;  %465 = vst.msk [vmem:[%s283_s13] sm:$0xf] %vm464_vm2, %v450_v5 }
 0x14a   : > { %v458_v9 = vpack.i.b16 %v447_v7, %v428_v3  ;;  %v461_v11 = vshrl.u32 %v447_v7, 16 }
 0x14b   : > { %466 = vst.msk [vmem:[%s283_s13 + $0x4] sm:$0xf] %vm464_vm2, %v454_v8 }
 0x14c   : > { %v462_v13 = vpack.i.b16 %v461_v11, %v460_v10  ;;  %467 = vst.msk [vmem:[%s283_s13 + $0x8] sm:$0xf] %vm464_vm2, %v458_v9 }
 0x14e   : > { %468 = vst.msk [vmem:[%s283_s13 + $0xc] sm:$0xf] %vm464_vm2, %v462_v13 }
 0x14f   : > { %1172 = shalt.err (!%p1169_p13)
}
 0x150   : > { %s1303_s8 = smov 4   ;;  %s1669_s13 = smov 64   ;;  %v600_v14 = vpop.permute.xlu2 %599  ;;  %v470_v16 = vpop.permute.xlu1 %469 }
 0x151   : > { %997 = dma.vmem_to_hbm [thread:$0]  (%p1407_p4), %s754_s28, 256, %s756_s11, %s730_s17, %s1669_s13, %s1669_s13, %s1303_s8   ;;  %v480_v18 = vshrl.u32 %v470_v16, 16  ;;  %v610_v31 = vshrl.u32 %v600_v14, 16 }
 0x152   : > { %s770_s12 = scalar_lea.hbm %s1655_s4, %s1490_s10  ;;  %s734_s27 = sand.u32 1, %s1365_s24  }
 0x153   : > { %s290_s26 = scalar_lea.vmem [#allocation8], %s1479_s7  ;;  %s1567_s28 = sshll.u32 %s770_s12, 4  ;;  %s774_s28 = int_to_ptr.hbm [resolvable:$true] %s1567_s28 }
 0x154   : > { %s771_s25 = sshll.u32 %s290_s26, 4  ;;  %s1580_s24 = scalar_lea.sflag [#allocation9], %s734_s27  ;;  %s772_s25 = int_to_ptr.vmem [resolvable:$true] %s771_s25 }
 0x155   : > { %s1187_s11 = sshra.s32 %s774_s28, 4  ;;  %s1193_s21 = scalar_lea.hbm %s1655_s4, 32  ;;  %s1188_s11 = int_to_ptr.hbm [resolvable:$true] %s1187_s11 }
 0x156   : > { %s1189_s17 = scalar_lea.hbm %s1188_s11, 16  ;;  %p1194_p8 = scmp.lt.s32.totalorder %s1188_s11, %s1655_s4 }
 0x157   : > { %p1190_p0 = scmp.ne.s32.totalorder %s1188_s11, %s1189_s17  ;;  %p1195_p1 = scmp.lt.s32.totalorder %s1193_s21, %s1189_s17 }
 0x159   : > { %p1191_p2 = pnand %p1190_p0, %p1407_p4  ;;  %p1196_p3 = por %p1195_p1, %p1194_p8 }
 0x15b   : > { %p1192_p5 = pneg %p1191_p2 }
 0x15d   : > { %p1197_p9 = pnand %p1196_p3, %p1192_p5 }
 0x183   : > { %v472_v15 = vpop.permute.xlu2 %471 }
 0x184   : > { %v481_v17 = vshrl.u32 %v472_v15, 16  ;;  %v479_v19 = vpack.i.b16 %v472_v15, %v470_v16 }
 0x186   : > { %v482_v21 = vpack.i.b16 %v481_v17, %v480_v18  ;;  %v493_v23 = vperm.slane %v479_v19, %v1446_v12 }
 0x188   : > { %v519_v27 = vperm.slane %v482_v21, %v1446_v12  ;;  %v501_v32 = vrot.slane %v493_v23, 4 }
 0x18a   : > { %v527_v37 = vrot.slane %v519_v27, 4 }
 0x18b   : > { %v476_v22 = vpop.permute.xlu2 %475 }
 0x18c   : > { %v487_v28 = vshrl.u32 %v476_v22, 16 }
 0x19b   : > { %v602_v20 = vpop.permute.xlu0 %601 }
 0x19c   : > { %v611_v24 = vshrl.u32 %v602_v20, 16  ;;  %v609_v33 = vpack.i.b16 %v602_v20, %v600_v14 }
 0x19e   : > { %v612_v36 = vpack.i.b16 %v611_v24, %v610_v31  ;;  %v623_v43 = vperm.slane %v609_v33, %v1446_v12 }
 0x1a0   : > { %v649_v47 = vperm.slane %v612_v36, %v1446_v12  ;;  %v631_v60 = vrot.slane %v623_v43, 4 }
 0x1a2   : > { %v657_v0 = vrot.slane %v649_v47, 4 }
 0x1a3   : > { %v604_v42 = vpop.permute.xlu0 %603 }
 0x1a4   : > { %v474_v26 = vpop.permute.xlu1 %473  ;;  %v616_v53 = vshrl.u32 %v604_v42, 16 }
 0x1a5   : > { %v485_v29 = vpack.i.b16 %v476_v22, %v474_v26  ;;  %v486_v30 = vshrl.u32 %v474_v26, 16 }
 0x1a7   : > { %v488_v34 = vpack.i.b16 %v487_v28, %v486_v30  ;;  %v498_v35 = vperm.slane %v485_v29, %v1446_v12 }
 0x1a9   : > { %v499_v38 = vrot.slane %v498_v35, 4  ;;  %v502_v39 = vsel %vm368_vm1, %v498_v35, %v501_v32  ;;  %v524_v40 = vperm.slane %v488_v34, %v1446_v12 }
 0x1aa   : > { %v510_v41 = vperm.slane %v502_v39, %v1451_v25 }
 0x1ab   : > { %v500_v44 = vsel %vm368_vm1, %v499_v38, %v493_v23  ;;  %v525_v45 = vrot.slane %v524_v40, 4  ;;  %v528_v46 = vsel %vm368_vm1, %v524_v40, %v527_v37 }
 0x1ac   : > { %v506_v48 = vperm.slane %v500_v44, %v1451_v25  ;;  %v513_v49 = vrot.slane %v510_v41, 4  ;;  %v536_v50 = vperm.slane %v528_v46, %v1451_v25  ;;  %v606_v51 = vpop.permute.xlu1 %605 }
 0x1ad   : > { %v526_v52 = vsel %vm368_vm1, %v525_v45, %v519_v27  ;;  %v615_v54 = vpack.i.b16 %v606_v51, %v604_v42  ;;  %v617_v55 = vshrl.u32 %v606_v51, 16 }
 0x1ae   : > { %v511_v56 = vrot.slane %v506_v48, 4  ;;  %v514_v57 = vsel %vm368_vm1, 0, %v513_v49  ;;  %v532_v58 = vperm.slane %v526_v52, %v1451_v25  ;;  %v539_v59 = vrot.slane %v536_v50, 4 }
 0x1af   : > { %v546_v61 = vrot.slane %v514_v57, 4  ;;  %v618_v62 = vpack.i.b16 %v617_v55, %v616_v53  ;;  %v628_v63 = vperm.slane %v615_v54, %v1446_v12  ;;  %v541_v4 = vsel %vm368_vm1, %v513_v49, %v506_v48 }
 0x1b0   : > { %v512_v1 = vsel %vm368_vm1, 0, %v511_v56  ;;  %v537_v2 = vrot.slane %v532_v58, 4  ;;  %v540_v3 = vsel %vm368_vm1, 0, %v539_v59  ;;  %v560_v10 = vsel %vm368_vm1, %v539_v59, %v532_v58 }
 0x1b1   : > { %v547_v5 = vsel %vm368_vm1, %v546_v61, %v512_v1  ;;  %v565_v6 = vrot.slane %v540_v3, 4  ;;  %v629_v7 = vrot.slane %v628_v63, 4  ;;  %v632_v11 = vsel %vm368_vm1, %v628_v63, %v631_v60 }
 0x1b2   : > { %v538_v8 = vsel %vm368_vm1, 0, %v537_v2  ;;  %v551_v9 = vperm.slane %v547_v5, %v1446_v12  ;;  %v640_v15 = vperm.slane %v632_v11, %v1451_v25  ;;  %v654_v16 = vperm.slane %v618_v62, %v1446_v12 }
 0x1b3   : > { %v566_v13 = vsel %vm368_vm1, %v565_v6, %v538_v8  ;;  %v630_v14 = vsel %vm368_vm1, %v629_v7, %v623_v43  ;;  %v545_v17 = vperm.slane %v541_v4, %v1446_v12  ;;  %v564_v21 = vperm.slane %v560_v10, %v1446_v12 }
 0x1b4   : > { %v552_v18 = vrot.slane %v551_v9, 4  ;;  %v570_v19 = vperm.slane %v566_v13, %v1446_v12  ;;  %v636_v20 = vperm.slane %v630_v14, %v1451_v25  ;;  %v643_v22 = vrot.slane %v640_v15, 4 }
 0x1b5   : > { %v655_v23 = vrot.slane %v654_v16, 4  ;;  %v658_v24 = vsel %vm368_vm1, %v654_v16, %v657_v0 }
 0x1b6   : > { %v553_v26 = vsel %vm368_vm1, %v552_v18, %v545_v17  ;;  %v571_v27 = vrot.slane %v570_v19, 4  ;;  %v641_v28 = vrot.slane %v636_v20, 4  ;;  %v666_v29 = vperm.slane %v658_v24, %v1451_v25 }
 0x1b7   : > { %v557_v30 = vperm.slane %v553_v26, %v1451_v25  ;;  %v644_v31 = vsel %vm368_vm1, 0, %v643_v22  ;;  %v656_v32 = vsel %vm368_vm1, %v655_v23, %v649_v47  ;;  %v671_v48 = vsel %vm368_vm1, %v643_v22, %v636_v20 }
 0x1b8   : > { %v572_v33 = vsel %vm368_vm1, %v571_v27, %v564_v21  ;;  %v662_v34 = vperm.slane %v656_v32, %v1451_v25  ;;  %v669_v35 = vrot.slane %v666_v29, 4  ;;  %v642_v38 = vsel %vm368_vm1, 0, %v641_v28 }
 0x1b9   : > { %v558_v36 = vrot.slane %v557_v30, 4  ;;  %v576_v37 = vperm.slane %v572_v33, %v1451_v25  ;;  %v583_v39 = vshrl.u32 %v557_v30, 16  ;;  %v676_v42 = vrot.slane %v644_v31, 4 }
 0x1ba   : > { %v667_v40 = vrot.slane %v662_v34, 4  ;;  %v670_v41 = vsel %vm368_vm1, 0, %v669_v35  ;;  %v675_v57 = vperm.slane %v671_v48, %v1446_v12  ;;  %v690_v59 = vsel %vm368_vm1, %v669_v35, %v662_v34 }
 0x1bb   : > { %v559_v43 = vsel %vm368_vm1, 0, %v558_v36  ;;  %v577_v44 = vrot.slane %v576_v37, 4  ;;  %v581_v45 = vpack.i.b16 %v576_v37, %v557_v30  ;;  %v584_v46 = vshrl.u32 %v576_v37, 16 }
 0x1bc   : > { %v668_v47 = vsel %vm368_vm1, 0, %v667_v40  ;;  %v677_v49 = vsel %vm368_vm1, %v676_v42, %v642_v38  ;;  %v695_v53 = vrot.slane %v670_v41, 4  ;;  %v591_v55 = vshrl.u32 %v559_v43, 16 }
 0x1bd   : > { %v578_v50 = vsel %vm368_vm1, 0, %v577_v44  ;;  %v585_v51 = vpack.i.b16 %v584_v46, %v583_v39  ;;  %v681_v52 = vperm.slane %v677_v49, %v1446_v12  ;;  %595 = vst.msk [vmem:[%s290_s26] sm:$0xf] %vm464_vm2, %v581_v45  ;;  %v694_v1 = vperm.slane %v690_v59, %v1446_v12 }
 0x1be   : > { %v589_v54 = vpack.i.b16 %v578_v50, %v559_v43  ;;  %v592_v56 = vshrl.u32 %v578_v50, 16  ;;  %v696_v60 = vsel %vm368_vm1, %v695_v53, %v668_v47 }
 0x1bf   : > { %v682_v58 = vrot.slane %v681_v52, 4  ;;  %596 = vst.msk [vmem:[%s290_s26 + $0x4] sm:$0xf] %vm464_vm2, %v585_v51  ;;  %v700_v62 = vperm.slane %v696_v60, %v1446_v12 }
 0x1c0   : > { %v593_v61 = vpack.i.b16 %v592_v56, %v591_v55  ;;  %597 = vst.msk [vmem:[%s290_s26 + $0x8] sm:$0xf] %vm464_vm2, %v589_v54 }
 0x1c1   : > { %v683_v63 = vsel %vm368_vm1, %v682_v58, %v675_v57  ;;  %v701_v2 = vrot.slane %v700_v62, 4 }
 0x1c2   : > { %v687_v0 = vperm.slane %v683_v63, %v1451_v25  ;;  %598 = vst.msk [vmem:[%s290_s26 + $0xc] sm:$0xf] %vm464_vm2, %v593_v61 }
 0x1c3   : > { %1200 = shalt.err (!%p1197_p9)
}
 0x1c4   : > { %998 = dma.vmem_to_hbm [thread:$0]  (%p1407_p4), %s772_s25, 256, %s774_s28, %s1580_s24, %s1669_s13, %s1669_s13, %s1303_s8   ;;  %v688_v12 = vrot.slane %v687_v0, 4  ;;  %v702_v3 = vsel %vm368_vm1, %v701_v2, %v694_v1  ;;  %v713_v5 = vshrl.u32 %v687_v0, 16 }
 0x1c5   : > { %v706_v4 = vperm.slane %v702_v3, %v1451_v25  ;;  %s788_s27 = scalar_lea.hbm %s1656_s5, %s1490_s10  ;;  %s297_s25 = scalar_lea.vmem [#allocation10], %s1479_s7 }
 0x1c6   : > { %v689_v6 = vsel %vm368_vm1, 0, %v688_v12  ;;  %s1604_s26 = sshll.u32 %s788_s27, 4  ;;  %s789_s28 = sshll.u32 %s297_s25, 4  ;;  %s790_s28 = int_to_ptr.vmem [resolvable:$true] %s789_s28  ;;  %s792_s26 = int_to_ptr.hbm [resolvable:$true] %s1604_s26 }
 0x1c7   : > { %v707_v7 = vrot.slane %v706_v4, 4  ;;  %v711_v8 = vpack.i.b16 %v706_v4, %v687_v0  ;;  %v714_v9 = vshrl.u32 %v706_v4, 16  ;;  %v721_v13 = vshrl.u32 %v689_v6, 16  ;;  %s1215_s10 = sshra.s32 %s792_s26, 4  ;;  %s1221_s29 = scalar_lea.hbm %s1656_s5, 32  ;;  %s1216_s10 = int_to_ptr.hbm [resolvable:$true] %s1215_s10 }
 0x1c8   : > { %s1217_s11 = scalar_lea.hbm %s1216_s10, 16  ;;  %p1222_p13 = scmp.lt.s32.totalorder %s1216_s10, %s1656_s5 }
 0x1c9   : > { %v708_v10 = vsel %vm368_vm1, 0, %v707_v7  ;;  %v715_v11 = vpack.i.b16 %v714_v9, %v713_v5  ;;  %725 = vst.msk [vmem:[%s297_s25] sm:$0xf] %vm464_vm2, %v711_v8  ;;  %p1218_p10 = scmp.ne.s32.totalorder %s1216_s10, %s1217_s11  ;;  %p1223_p0 = scmp.lt.s32.totalorder %s1221_s29, %s1217_s11 }
 0x1ca   : > { %v719_v25 = vpack.i.b16 %v708_v10, %v689_v6  ;;  %v722_v14 = vshrl.u32 %v708_v10, 16 }
 0x1cb   : > { %726 = vst.msk [vmem:[%s297_s25 + $0x4] sm:$0xf] %vm464_vm2, %v715_v11  ;;  %p1219_p11 = pnand %p1218_p10, %p1407_p4  ;;  %p1224_p2 = por %p1223_p0, %p1222_p13 }
 0x1cc   : > { %v723_v15 = vpack.i.b16 %v722_v14, %v721_v13  ;;  %727 = vst.msk [vmem:[%s297_s25 + $0x8] sm:$0xf] %vm464_vm2, %v719_v25 }
 0x1cd   : > { %p1220_p12 = pneg %p1219_p11 }
 0x1ce   : > { %728 = vst.msk [vmem:[%s297_s25 + $0xc] sm:$0xf] %vm464_vm2, %v723_v15 }
 0x1cf   : > { %p1225_p5 = pnand %p1224_p2, %p1220_p12 }
 0x1d1   : > { %1228 = shalt.err (!%p1225_p5)
}
 0x1d2   : > { %999 = dma.vmem_to_hbm [thread:$0]  (%p1407_p4), %s790_s28, 256, %s792_s26, %s1580_s24, %s1669_s13, %s1669_s13, %s1303_s8  }
 0x1d3 PF: > { %s806_s6 = sand.u32 1, %s1271_s18   ;;  %p1012_p8 = pnand %p957_p6, %p1415_p7 }
 0x1d4   : > { %s807_s0 = scalar_lea.sflag [#allocation4], %s806_s6 }
 0x1d5   : > { %p1013_p1 = pneg %p1012_p8 }
 0x1d7   : > { %1262 = dma.done.wait (%p1013_p1), %s807_s0, 256  }
 0x1d8   : > { %1264 = vsyncadd (%p1013_p1), %s807_s0, 4294967040  ;;  %s1670_s1 = sadd.s32 4294967294, %s1291_s23  }
 0x1d9   : > { %s816_s14 = sand.u32 1, %s1670_s1  }
 0x1da   : > { %s817_s12 = scalar_lea.sflag [#allocation9], %s816_s14 }
 0x1db   : > { %1266 = dma.done.wait (%p1013_p1), %s817_s12, 512  }
 0x1dc   : > { %1268 = vsyncadd (%p1013_p1), %s817_s12, 4294966784  ;;  %s26_s23 = sadd.s32 1, %s1291_s23   ;;  %s1671_s18 = smov %s1275_s19 }
 0x1dd   : > { %p23_p4 = scmp.ge.s32.totalorder %s26_s23, 4   ;;  %s1672_s19 = smov %s1279_s20 }
 0x1de   : > { %s1673_s20 = smov %s1413_s15  ;;  %s1674_s21 = smov %s1287_s22 }
 0x1df   : > { %s1675_s22 = smov %s1677_s9  ;;  %25 = sbr.rel (!%p23_p4) target bundleno = 12 (0xc), region = 113 }
 0x1e4   :  { %833 = vsyncpa [#allocation3], 1 }
 0x1e5   :  { %835 = vsyncpa [#allocation3 + $0x1], 1 }
 0x1e6   :  { %836 = vsyncpa [#allocation6], 1 }
 0x1e7   :  { %837 = vsyncpa [#allocation4], 1 }
 0x1e8   :  { %839 = vsyncpa [#allocation4 + $0x1], 1 }
 0x1e9   :  { %840 = vsyncpa [#allocation9], 1 }
 0x1ea   :  { %842 = vsyncpa [#allocation9 + $0x1], 1 }

</bundles_post_ra>
